<compile_context>
chip_gen: v7x
topology: tpu7x:2x2x1
jax: 0.10.0
libtpu: 0.0.40
codegen_flags: <defaults>
</compile_context>

<pallas_src>
import jax
import jax.numpy as jnp
from jax.experimental import pallas as pl
from jax.experimental.pallas import tpu as pltpu

MODEL_DIM = 16 ** 2                      # 256
NUM_HEADS = 8
DIM_PER_HEAD = MODEL_DIM // NUM_HEADS    # 32


def mha_kernel(x_ref, wqkv_ref, wo_ref, bqkv_ref, bo_ref, out_ref, attn_ref,
               ctx_ref):
    TB, S, D = x_ref.shape
    H = attn_ref.shape[1]
    d = D // H
    scale = d ** (-0.5)

    # ---- Fused Q/K/V projection: one MXU matmul over all TB*S rows. -------
    x2 = x_ref[...].reshape(TB * S, D).astype(jnp.bfloat16)
    qkv = jnp.dot(x2, wqkv_ref[...], preferred_element_type=jnp.float32)
    qkv = qkv + bqkv_ref[0]                                   # (TB*S, 3D) f32

    # Fold the 1/sqrt(d) scale into q (in f32, before the bf16 cast) and cast
    # q/k/v to bf16 exactly once; per-head access below is pure slicing.
    q = (qkv[:, 0 * D:1 * D] * scale).astype(jnp.bfloat16).reshape(TB, S, D)
    k = qkv[:, 1 * D:2 * D].astype(jnp.bfloat16).reshape(TB, S, D)
    v = qkv[:, 2 * D:3 * D].astype(jnp.bfloat16).reshape(TB, S, D)

    # ---- Per-head attention, batched over the TB sequences. ---------------
    # TODO(synk): when S is large enough for attention FLOPs to dominate,
    # batch the QK^T / PV matmuls across heads ('bhqd,bhkd->bhqk') and add
    # flash-style head/query-block tiling so the resident score block stays
    # inside v7x's 64 MiB VMEM.
    for h in range(H):                                        # static unroll
        sl = slice(h * d, (h + 1) * d)
        q_h = q[:, :, sl]                                     # (TB, S, d) bf16
        k_h = k[:, :, sl]
        v_h = v[:, :, sl]

        # Scores: contraction over the head dim (no explicit k transpose).
        s = jnp.einsum('bqd,bkd->bqk', q_h, k_h,
                       preferred_element_type=jnp.float32)    # (TB, S, S) f32

        # Softmax(dim=-1), numerically stable; the divide goes to the EUP.
        m = jnp.max(s, axis=-1, keepdims=True)
        e = jnp.exp(s - m)
        p = e * pl.reciprocal(jnp.sum(e, axis=-1, keepdims=True), approx=True)

        # TODO(synk): for bench shapes, stage p into a lane-dense (TB, H*S*S)
        # slab and/or store it as bf16; at S=8 the f32 4-D writeback is tiny.
        attn_ref[:, h, :, :] = p.astype(attn_ref.dtype)

        # Stage this head's context into its lane slice of the (TB, S, D)
        # scratch slab; the output projection happens once, below.
        ctx_ref[:, :, sl] = jnp.einsum('bqk,bkd->bqd', p.astype(jnp.bfloat16),
                                       v_h, preferred_element_type=jnp.float32)

    # ---- Output projection: ONE (TB*S, D) x (D, D) matmul (K = 256 fills
    # the MXU depth) instead of H accumulate passes with K = d = 32. --------
    ctx = ctx_ref[...].reshape(TB * S, D).astype(jnp.bfloat16)
    out = jnp.dot(ctx, wo_ref[...], preferred_element_type=jnp.float32)
    out = out + bo_ref[0]
    out_ref[...] = out.reshape(TB, S, D).astype(out_ref.dtype)
    # Dropout has p=0.0 in the module default, so it is an identity.


def _vmem_limit_bytes():
    """Explicit scoped-VMEM limit: ~3/4 of physical, capped at 96 MiB.
    (v5e/v6e: 128 MiB physical -> 96 MiB; v7x: 64 MiB -> 48 MiB.)"""
    cap = 64 * 1024 * 1024
    try:
        cap = int(getattr(pltpu.get_tpu_info(), "vmem_capacity_bytes", cap))
    except Exception:
        pass
    return int(min(cap * 3 // 4, 96 * 1024 * 1024))


def _pick_block_batch(B, S, D, H, vmem_limit, target_rows=256):
    """How many sequences to process per grid step.

    Smallest divisor of B whose TB*S reaches the MXU row target, subject to
    (a) keeping >= 2 grid steps whenever B >= 2 (so both v7x TensorCores get
    work; harmless on 1-TC v5e/v6e), and (b) the real VMEM footprint:
    double-buffered x / out / attn blocks, double-buffered weights and the
    in-kernel intermediates (f32 qkv slab, bf16 q/k/v, ctx scratch, scores).
    """
    # TB-independent: double-buffered bf16 weights + f32 biases.
    weight_bytes = 2 * ((D * 3 * D + D * D) * 2 + (3 * D + D) * 4)
    budget = int(vmem_limit * 0.7) - weight_bytes
    min_grid = 2 if B >= 2 else 1
    best = 1
    for tb in range(1, B + 1):
        if B % tb or (B // tb) < min_grid:
            continue
        x_blk = tb * S * D * 4                     # f32 (TB, S, D)
        attn_blk = tb * H * S * S * 4              # f32 (TB, H, S, S)
        score_blk = tb * S * S * 4                 # one head's f32 scores
        # Intermediates: f32 qkv (3x x_blk), bf16 x/q/k/v (~2x), ctx scratch
        # (1x), out slab (1x) ~= 7x the x block, plus ~3 score-sized temps.
        intermediates = 7 * x_blk + 3 * score_blk
        need = 2 * (2 * x_blk + attn_blk) + intermediates
        if need > budget:
            break
        best = tb
        if tb * S >= target_rows:
            break
    # TODO(synk): if even TB=1 exceeds the budget (very large S), switch to
    # flash-style head/query-block tiling instead of one resident block.
    return best


def multi_head_attention(x, wq, wk, wv, wo, bq, bk, bv, bo):
    """x: (B, S, D) float32. Weights (D, D) pre-transposed to (in, out).
    Returns (output (B, S, D), attention (B*H, S, S)) like the PyTorch module."""
    B, S, D = x.shape
    H = NUM_HEADS
    assert D == MODEL_DIM

    # Host-side weight fusion / dtype prep (done once per call).
    w_qkv = jnp.concatenate([wq, wk, wv], axis=1).astype(jnp.bfloat16)  # (D,3D)
    b_qkv = jnp.concatenate([bq, bk, bv]).reshape(1, 3 * D).astype(jnp.float32)
    wo_bf = wo.astype(jnp.bfloat16)                                     # (D, D)
    bo2 = bo.reshape(1, D).astype(jnp.float32)

    vmem_limit = _vmem_limit_bytes()
    TB = _pick_block_batch(B, S, D, H, vmem_limit)
    grid = (B // TB,)

    out, attn = pl.pallas_call(
        mha_kernel,
        out_shape=(
            jax.ShapeDtypeStruct((B, S, D), jnp.float32),
            jax.ShapeDtypeStruct((B, H, S, S), jnp.float32),
        ),
        grid_spec=pltpu.PrefetchScalarGridSpec(
            num_scalar_prefetch=0,
            grid=grid,
            in_specs=[
                pl.BlockSpec((TB, S, D), lambda b: (b, 0, 0)),        # x
                pl.BlockSpec((D, 3 * D), lambda b: (0, 0)),           # W_qkv
                pl.BlockSpec((D, D), lambda b: (0, 0)),               # W_o
                pl.BlockSpec((1, 3 * D), lambda b: (0, 0)),           # b_qkv
                pl.BlockSpec((1, D), lambda b: (0, 0)),               # b_o
            ],
            out_specs=[
                pl.BlockSpec((TB, S, D), lambda b: (b, 0, 0)),
                pl.BlockSpec((TB, H, S, S), lambda b: (b, 0, 0, 0)),
            ],
            scratch_shapes=[pltpu.VMEM((TB, S, D), jnp.float32)],     # ctx slab
        ),
        compiler_params=pltpu.CompilerParams(
            dimension_semantics=("parallel",),
            vmem_limit_bytes=vmem_limit),
    )(x, w_qkv, wo_bf, b_qkv, bo2)

    # PyTorch returns attention as (B * num_heads, S, S).
    return out, attn.reshape(B * H, S, S)


def reference(x, wq, wk, wv, wo, bq, bk, bv, bo):
    """Pure-JAX f32 reference mirroring the PyTorch forward."""
    B, S, D = x.shape
    H, d = NUM_HEADS, DIM_PER_HEAD

    def to_heads(t):
        return t.reshape(B, S, H, d).transpose(0, 2, 1, 3).reshape(B * H, S, d)

    q = to_heads(x @ wq + bq)
    k = to_heads(x @ wk + bk)
    v = to_heads(x @ wv + bv)
    scale = d ** (-0.5)
    attn = jax.nn.softmax(jnp.einsum('bqd,bkd->bqk', q, k) * scale, axis=-1)
    ctx = jnp.einsum('bqk,bkd->bqd', attn, v)
    ctx = ctx.reshape(B, H, S, d).transpose(0, 2, 1, 3).reshape(B, S, D)
    out = ctx @ wo + bo
    return out, attn


if __name__ == "__main__":
    B, S, D = 2, 8, MODEL_DIM

    key = jax.random.PRNGKey(0)
    ks = jax.random.split(key, 9)
    bound = 1.0 / (D ** 0.5)   # nn.Linear-style uniform init bound
    x = jax.random.normal(ks[0], (B, S, D), dtype=jnp.float32)
    wq = jax.random.uniform(ks[1], (D, D), jnp.float32, -bound, bound)
    wk = jax.random.uniform(ks[2], (D, D), jnp.float32, -bound, bound)
    wv = jax.random.uniform(ks[3], (D, D), jnp.float32, -bound, bound)
    wo = jax.random.uniform(ks[4], (D, D), jnp.float32, -bound, bound)
    bq = jax.random.uniform(ks[5], (D,), jnp.float32, -bound, bound)
    bk = jax.random.uniform(ks[6], (D,), jnp.float32, -bound, bound)
    bv = jax.random.uniform(ks[7], (D,), jnp.float32, -bound, bound)
    bo = jax.random.uniform(ks[8], (D,), jnp.float32, -bound, bound)

    out, attn = multi_head_attention(x, wq, wk, wv, wo, bq, bk, bv, bo)
    out = jax.block_until_ready(out)
    attn = jax.block_until_ready(attn)

    ref_out, ref_attn = reference(x, wq, wk, wv, wo, bq, bk, bv, bo)
    assert out.shape == (B, S, D)
    assert attn.shape == (B * NUM_HEADS, S, S)
    # bf16 matmul inputs (f32 accumulation) => tolerances loosened vs pure f32.
    assert jnp.allclose(out, ref_out, atol=2e-2, rtol=2e-2)
    assert jnp.allclose(attn, ref_attn, atol=2e-2, rtol=2e-2)

    print("KERNEL_OK")
</pallas_src>

<mosaic_0001>
module attributes {stable_mosaic.version = 11 : i64} {
  func.func @mha_kernel(%arg0: i32, %arg1: memref<1x8x256xf32, #tpu.memory_space<vmem>>, %arg2: memref<256x768xbf16, #tpu.memory_space<vmem>>, %arg3: memref<256x256xbf16, #tpu.memory_space<vmem>>, %arg4: memref<1x768xf32, #tpu.memory_space<vmem>>, %arg5: memref<1x256xf32, #tpu.memory_space<vmem>>, %arg6: memref<1x8x256xf32, #tpu.memory_space<vmem>>, %arg7: memref<1x8x8x8xf32, #tpu.memory_space<vmem>>, %arg8: memref<1x8x256xf32, #tpu.memory_space<vmem>>) attributes {dimension_semantics = [#tpu.dimension_semantics<parallel>], iteration_bounds = array<i64: 2>, scalar_prefetch = 0 : i64, scratch_operands = 1 : i64, tpu.core_type = #tpu.core_type<tc>, window_params = [{transform_indices = @transform_0, window_bounds = array<i64: 1, 8, 256>}, {pipeline_mode = #tpu.pipeline_mode<synchronous>, transform_indices = @transform_1, window_bounds = array<i64: 256, 768>}, {pipeline_mode = #tpu.pipeline_mode<synchronous>, transform_indices = @transform_2, window_bounds = array<i64: 256, 256>}, {pipeline_mode = #tpu.pipeline_mode<synchronous>, transform_indices = @transform_3, window_bounds = array<i64: 1, 768>}, {pipeline_mode = #tpu.pipeline_mode<synchronous>, transform_indices = @transform_4, window_bounds = array<i64: 1, 256>}, {transform_indices = @transform_5, window_bounds = array<i64: 1, 8, 256>}, {transform_indices = @transform_6, window_bounds = array<i64: 1, 8, 8, 8>}]} {
    %c0 = arith.constant 0 : index
    %c0_0 = arith.constant 0 : index
    %c0_1 = arith.constant 0 : index
    %0 = vector.load %arg1[%c0, %c0_0, %c0_1] : memref<1x8x256xf32, #tpu.memory_space<vmem>>, vector<1x8x256xf32>
    %1 = vector.shape_cast %0 : vector<1x8x256xf32> to vector<8x256xf32>
    %2 = arith.truncf %1 : vector<8x256xf32> to vector<8x256xbf16>
    %c0_2 = arith.constant 0 : index
    %c0_3 = arith.constant 0 : index
    %3 = vector.load %arg2[%c0_2, %c0_3] : memref<256x768xbf16, #tpu.memory_space<vmem>>, vector<256x768xbf16>
    %cst = arith.constant dense<0.000000e+00> : vector<8x768xf32>
    %4 = tpu.matmul %2, %3, %cst {dimension_numbers = #tpu.dot_dimension_numbers<[1], [0], [0], [1], [0, 0, 1, 1], [], []>} : vector<8x256xbf16>, vector<256x768xbf16>, vector<8x768xf32> -> vector<8x768xf32>
    %c0_4 = arith.constant 0 : index
    %c0_5 = arith.constant 0 : index
    %5 = vector.load %arg4[%c0_4, %c0_5] : memref<1x768xf32, #tpu.memory_space<vmem>>, vector<1x768xf32>
    %6 = vector.shape_cast %5 : vector<1x768xf32> to vector<768xf32>
    %7 = vector.shape_cast %6 : vector<768xf32> to vector<1x768xf32>
    %8 = vector.broadcast %7 : vector<1x768xf32> to vector<8x768xf32>
    %9 = arith.addf %4, %8 : vector<8x768xf32>
    %10 = vector.extract_strided_slice %9 {offsets = [0, 0], sizes = [8, 256], strides = [1, 1]} : vector<8x768xf32> to vector<8x256xf32>
    %cst_6 = arith.constant 0.176776692 : f32
    %11 = vector.broadcast %cst_6 : f32 to vector<8x256xf32>
    %12 = arith.mulf %10, %11 : vector<8x256xf32>
    %13 = arith.truncf %12 : vector<8x256xf32> to vector<8x256xbf16>
    %14 = vector.shape_cast %13 : vector<8x256xbf16> to vector<1x8x256xbf16>
    %15 = vector.extract_strided_slice %9 {offsets = [0, 256], sizes = [8, 256], strides = [1, 1]} : vector<8x768xf32> to vector<8x256xf32>
    %16 = arith.truncf %15 : vector<8x256xf32> to vector<8x256xbf16>
    %17 = vector.shape_cast %16 : vector<8x256xbf16> to vector<1x8x256xbf16>
    %18 = vector.extract_strided_slice %9 {offsets = [0, 512], sizes = [8, 256], strides = [1, 1]} : vector<8x768xf32> to vector<8x256xf32>
    %19 = arith.truncf %18 : vector<8x256xf32> to vector<8x256xbf16>
    %20 = vector.shape_cast %19 : vector<8x256xbf16> to vector<1x8x256xbf16>
    %21 = vector.extract_strided_slice %14 {offsets = [0, 0, 0], sizes = [1, 8, 32], strides = [1, 1, 1]} : vector<1x8x256xbf16> to vector<1x8x32xbf16>
    %22 = vector.extract_strided_slice %17 {offsets = [0, 0, 0], sizes = [1, 8, 32], strides = [1, 1, 1]} : vector<1x8x256xbf16> to vector<1x8x32xbf16>
    %23 = vector.extract_strided_slice %20 {offsets = [0, 0, 0], sizes = [1, 8, 32], strides = [1, 1, 1]} : vector<1x8x256xbf16> to vector<1x8x32xbf16>
    "tpu.trace_start"() <{level = 10 : i32, message = "bqd,bkd->bqk"}> : () -> ()
    %cst_7 = arith.constant dense<0.000000e+00> : vector<1x8x8xf32>
    %24 = tpu.matmul %21, %22, %cst_7 {dimension_numbers = #tpu.dot_dimension_numbers<[2], [2], [1], [1], [0, 0, 0, 1, 1, 1], [0], [0]>} : vector<1x8x32xbf16>, vector<1x8x32xbf16>, vector<1x8x8xf32> -> vector<1x8x8xf32>
    "tpu.trace_stop"() : () -> ()
    %cst_8 = arith.constant dense<0xFF800000> : vector<1x8xf32>
    %25 = vector.multi_reduction <maximumf>, %24, %cst_8 [2] : vector<1x8x8xf32> to vector<1x8xf32>
    %26 = vector.shape_cast %25 : vector<1x8xf32> to vector<1x8x1xf32>
    %27 = vector.broadcast %26 : vector<1x8x1xf32> to vector<1x8x8xf32>
    %28 = arith.subf %24, %27 : vector<1x8x8xf32>
    %29 = math.exp %28 : vector<1x8x8xf32>
    %cst_9 = arith.constant dense<0.000000e+00> : vector<1x8xf32>
    %30 = vector.multi_reduction <add>, %29, %cst_9 [2] : vector<1x8x8xf32> to vector<1x8xf32>
    %31 = vector.shape_cast %30 : vector<1x8xf32> to vector<1x8x1xf32>
    %32 = tpu.reciprocal %31 {approx = true} : vector<1x8x1xf32> -> vector<1x8x1xf32>
    %33 = vector.broadcast %32 : vector<1x8x1xf32> to vector<1x8x8xf32>
    %34 = arith.mulf %29, %33 : vector<1x8x8xf32>
    %c0_10 = arith.constant 0 : index
    %c0_11 = arith.constant 0 : index
    %c0_12 = arith.constant 0 : index
    %c0_13 = arith.constant 0 : index
    %35 = vector.load %arg7[%c0_10, %c0_11, %c0_12, %c0_13] : memref<1x8x8x8xf32, #tpu.memory_space<vmem>>, vector<1x1x8x8xf32>
    %36 = vector.shape_cast %35 : vector<1x1x8x8xf32> to vector<1x8x8xf32>
    %37 = vector.shape_cast %34 : vector<1x8x8xf32> to vector<1x1x8x8xf32>
    tpu.vector_store %arg7[%c0_10, %c0_11, %c0_12, %c0_13], %37 {strides = array<i32>} : memref<1x8x8x8xf32, #tpu.memory_space<vmem>>, vector<1x1x8x8xf32>,
    %38 = arith.truncf %34 : vector<1x8x8xf32> to vector<1x8x8xbf16>
    "tpu.trace_start"() <{level = 10 : i32, message = "bqk,bkd->bqd"}> : () -> ()
    %cst_14 = arith.constant dense<0.000000e+00> : vector<1x8x32xf32>
    %39 = tpu.matmul %38, %23, %cst_14 {dimension_numbers = #tpu.dot_dimension_numbers<[2], [1], [1], [2], [0, 0, 0, 1, 1, 2], [0], [0]>} : vector<1x8x8xbf16>, vector<1x8x32xbf16>, vector<1x8x32xf32> -> vector<1x8x32xf32>
    "tpu.trace_stop"() : () -> ()
    %c0_15 = arith.constant 0 : index
    %c0_16 = arith.constant 0 : index
    %c0_17 = arith.constant 0 : index
    %40 = vector.load %arg8[%c0_15, %c0_16, %c0_17] : memref<1x8x256xf32, #tpu.memory_space<vmem>>, vector<1x8x32xf32>
    tpu.vector_store %arg8[%c0_15, %c0_16, %c0_17], %39 {strides = array<i32>} : memref<1x8x256xf32, #tpu.memory_space<vmem>>, vector<1x8x32xf32>,
    %41 = vector.extract_strided_slice %14 {offsets = [0, 0, 32], sizes = [1, 8, 32], strides = [1, 1, 1]} : vector<1x8x256xbf16> to vector<1x8x32xbf16>
    %42 = vector.extract_strided_slice %17 {offsets = [0, 0, 32], sizes = [1, 8, 32], strides = [1, 1, 1]} : vector<1x8x256xbf16> to vector<1x8x32xbf16>
    %43 = vector.extract_strided_slice %20 {offsets = [0, 0, 32], sizes = [1, 8, 32], strides = [1, 1, 1]} : vector<1x8x256xbf16> to vector<1x8x32xbf16>
    "tpu.trace_start"() <{level = 10 : i32, message = "bqd,bkd->bqk"}> : () -> ()
    %cst_18 = arith.constant dense<0.000000e+00> : vector<1x8x8xf32>
    %44 = tpu.matmul %41, %42, %cst_18 {dimension_numbers = #tpu.dot_dimension_numbers<[2], [2], [1], [1], [0, 0, 0, 1, 1, 1], [0], [0]>} : vector<1x8x32xbf16>, vector<1x8x32xbf16>, vector<1x8x8xf32> -> vector<1x8x8xf32>
    "tpu.trace_stop"() : () -> ()
    %cst_19 = arith.constant dense<0xFF800000> : vector<1x8xf32>
    %45 = vector.multi_reduction <maximumf>, %44, %cst_19 [2] : vector<1x8x8xf32> to vector<1x8xf32>
    %46 = vector.shape_cast %45 : vector<1x8xf32> to vector<1x8x1xf32>
    %47 = vector.broadcast %46 : vector<1x8x1xf32> to vector<1x8x8xf32>
    %48 = arith.subf %44, %47 : vector<1x8x8xf32>
    %49 = math.exp %48 : vector<1x8x8xf32>
    %cst_20 = arith.constant dense<0.000000e+00> : vector<1x8xf32>
    %50 = vector.multi_reduction <add>, %49, %cst_20 [2] : vector<1x8x8xf32> to vector<1x8xf32>
    %51 = vector.shape_cast %50 : vector<1x8xf32> to vector<1x8x1xf32>
    %52 = tpu.reciprocal %51 {approx = true} : vector<1x8x1xf32> -> vector<1x8x1xf32>
    %53 = vector.broadcast %52 : vector<1x8x1xf32> to vector<1x8x8xf32>
    %54 = arith.mulf %49, %53 : vector<1x8x8xf32>
    %c0_21 = arith.constant 0 : index
    %c1 = arith.constant 1 : index
    %c0_22 = arith.constant 0 : index
    %c0_23 = arith.constant 0 : index
    %55 = vector.load %arg7[%c0_21, %c1, %c0_22, %c0_23] : memref<1x8x8x8xf32, #tpu.memory_space<vmem>>, vector<1x1x8x8xf32>
    %56 = vector.shape_cast %55 : vector<1x1x8x8xf32> to vector<1x8x8xf32>
    %57 = vector.shape_cast %54 : vector<1x8x8xf32> to vector<1x1x8x8xf32>
    tpu.vector_store %arg7[%c0_21, %c1, %c0_22, %c0_23], %57 {strides = array<i32>} : memref<1x8x8x8xf32, #tpu.memory_space<vmem>>, vector<1x1x8x8xf32>,
    %58 = arith.truncf %54 : vector<1x8x8xf32> to vector<1x8x8xbf16>
    "tpu.trace_start"() <{level = 10 : i32, message = "bqk,bkd->bqd"}> : () -> ()
    %cst_24 = arith.constant dense<0.000000e+00> : vector<1x8x32xf32>
    %59 = tpu.matmul %58, %43, %cst_24 {dimension_numbers = #tpu.dot_dimension_numbers<[2], [1], [1], [2], [0, 0, 0, 1, 1, 2], [0], [0]>} : vector<1x8x8xbf16>, vector<1x8x32xbf16>, vector<1x8x32xf32> -> vector<1x8x32xf32>
    "tpu.trace_stop"() : () -> ()
    %c0_25 = arith.constant 0 : index
    %c0_26 = arith.constant 0 : index
    %c32 = arith.constant 32 : index
    %60 = vector.load %arg8[%c0_25, %c0_26, %c32] : memref<1x8x256xf32, #tpu.memory_space<vmem>>, vector<1x8x32xf32>
    tpu.vector_store %arg8[%c0_25, %c0_26, %c32], %59 {strides = array<i32>} : memref<1x8x256xf32, #tpu.memory_space<vmem>>, vector<1x8x32xf32>,
    %61 = vector.extract_strided_slice %14 {offsets = [0, 0, 64], sizes = [1, 8, 32], strides = [1, 1, 1]} : vector<1x8x256xbf16> to vector<1x8x32xbf16>
    %62 = vector.extract_strided_slice %17 {offsets = [0, 0, 64], sizes = [1, 8, 32], strides = [1, 1, 1]} : vector<1x8x256xbf16> to vector<1x8x32xbf16>
    %63 = vector.extract_strided_slice %20 {offsets = [0, 0, 64], sizes = [1, 8, 32], strides = [1, 1, 1]} : vector<1x8x256xbf16> to vector<1x8x32xbf16>
    "tpu.trace_start"() <{level = 10 : i32, message = "bqd,bkd->bqk"}> : () -> ()
    %cst_27 = arith.constant dense<0.000000e+00> : vector<1x8x8xf32>
    %64 = tpu.matmul %61, %62, %cst_27 {dimension_numbers = #tpu.dot_dimension_numbers<[2], [2], [1], [1], [0, 0, 0, 1, 1, 1], [0], [0]>} : vector<1x8x32xbf16>, vector<1x8x32xbf16>, vector<1x8x8xf32> -> vector<1x8x8xf32>
    "tpu.trace_stop"() : () -> ()
    %cst_28 = arith.constant dense<0xFF800000> : vector<1x8xf32>
    %65 = vector.multi_reduction <maximumf>, %64, %cst_28 [2] : vector<1x8x8xf32> to vector<1x8xf32>
    %66 = vector.shape_cast %65 : vector<1x8xf32> to vector<1x8x1xf32>
    %67 = vector.broadcast %66 : vector<1x8x1xf32> to vector<1x8x8xf32>
    %68 = arith.subf %64, %67 : vector<1x8x8xf32>
    %69 = math.exp %68 : vector<1x8x8xf32>
    %cst_29 = arith.constant dense<0.000000e+00> : vector<1x8xf32>
    %70 = vector.multi_reduction <add>, %69, %cst_29 [2] : vector<1x8x8xf32> to vector<1x8xf32>
    %71 = vector.shape_cast %70 : vector<1x8xf32> to vector<1x8x1xf32>
    %72 = tpu.reciprocal %71 {approx = true} : vector<1x8x1xf32> -> vector<1x8x1xf32>
    %73 = vector.broadcast %72 : vector<1x8x1xf32> to vector<1x8x8xf32>
    %74 = arith.mulf %69, %73 : vector<1x8x8xf32>
    %c0_30 = arith.constant 0 : index
    %c2 = arith.constant 2 : index
    %c0_31 = arith.constant 0 : index
    %c0_32 = arith.constant 0 : index
    %75 = vector.load %arg7[%c0_30, %c2, %c0_31, %c0_32] : memref<1x8x8x8xf32, #tpu.memory_space<vmem>>, vector<1x1x8x8xf32>
    %76 = vector.shape_cast %75 : vector<1x1x8x8xf32> to vector<1x8x8xf32>
    %77 = vector.shape_cast %74 : vector<1x8x8xf32> to vector<1x1x8x8xf32>
    tpu.vector_store %arg7[%c0_30, %c2, %c0_31, %c0_32], %77 {strides = array<i32>} : memref<1x8x8x8xf32, #tpu.memory_space<vmem>>, vector<1x1x8x8xf32>,
    %78 = arith.truncf %74 : vector<1x8x8xf32> to vector<1x8x8xbf16>
    "tpu.trace_start"() <{level = 10 : i32, message = "bqk,bkd->bqd"}> : () -> ()
    %cst_33 = arith.constant dense<0.000000e+00> : vector<1x8x32xf32>
    %79 = tpu.matmul %78, %63, %cst_33 {dimension_numbers = #tpu.dot_dimension_numbers<[2], [1], [1], [2], [0, 0, 0, 1, 1, 2], [0], [0]>} : vector<1x8x8xbf16>, vector<1x8x32xbf16>, vector<1x8x32xf32> -> vector<1x8x32xf32>
    "tpu.trace_stop"() : () -> ()
    %c0_34 = arith.constant 0 : index
    %c0_35 = arith.constant 0 : index
    %c64 = arith.constant 64 : index
    %80 = vector.load %arg8[%c0_34, %c0_35, %c64] : memref<1x8x256xf32, #tpu.memory_space<vmem>>, vector<1x8x32xf32>
    tpu.vector_store %arg8[%c0_34, %c0_35, %c64], %79 {strides = array<i32>} : memref<1x8x256xf32, #tpu.memory_space<vmem>>, vector<1x8x32xf32>,
    %81 = vector.extract_strided_slice %14 {offsets = [0, 0, 96], sizes = [1, 8, 32], strides = [1, 1, 1]} : vector<1x8x256xbf16> to vector<1x8x32xbf16>
    %82 = vector.extract_strided_slice %17 {offsets = [0, 0, 96], sizes = [1, 8, 32], strides = [1, 1, 1]} : vector<1x8x256xbf16> to vector<1x8x32xbf16>
    %83 = vector.extract_strided_slice %20 {offsets = [0, 0, 96], sizes = [1, 8, 32], strides = [1, 1, 1]} : vector<1x8x256xbf16> to vector<1x8x32xbf16>
    "tpu.trace_start"() <{level = 10 : i32, message = "bqd,bkd->bqk"}> : () -> ()
    %cst_36 = arith.constant dense<0.000000e+00> : vector<1x8x8xf32>
    %84 = tpu.matmul %81, %82, %cst_36 {dimension_numbers = #tpu.dot_dimension_numbers<[2], [2], [1], [1], [0, 0, 0, 1, 1, 1], [0], [0]>} : vector<1x8x32xbf16>, vector<1x8x32xbf16>, vector<1x8x8xf32> -> vector<1x8x8xf32>
    "tpu.trace_stop"() : () -> ()
    %cst_37 = arith.constant dense<0xFF800000> : vector<1x8xf32>
    %85 = vector.multi_reduction <maximumf>, %84, %cst_37 [2] : vector<1x8x8xf32> to vector<1x8xf32>
    %86 = vector.shape_cast %85 : vector<1x8xf32> to vector<1x8x1xf32>
    %87 = vector.broadcast %86 : vector<1x8x1xf32> to vector<1x8x8xf32>
    %88 = arith.subf %84, %87 : vector<1x8x8xf32>
    %89 = math.exp %88 : vector<1x8x8xf32>
    %cst_38 = arith.constant dense<0.000000e+00> : vector<1x8xf32>
    %90 = vector.multi_reduction <add>, %89, %cst_38 [2] : vector<1x8x8xf32> to vector<1x8xf32>
    %91 = vector.shape_cast %90 : vector<1x8xf32> to vector<1x8x1xf32>
    %92 = tpu.reciprocal %91 {approx = true} : vector<1x8x1xf32> -> vector<1x8x1xf32>
    %93 = vector.broadcast %92 : vector<1x8x1xf32> to vector<1x8x8xf32>
    %94 = arith.mulf %89, %93 : vector<1x8x8xf32>
    %c0_39 = arith.constant 0 : index
    %c3 = arith.constant 3 : index
    %c0_40 = arith.constant 0 : index
    %c0_41 = arith.constant 0 : index
    %95 = vector.load %arg7[%c0_39, %c3, %c0_40, %c0_41] : memref<1x8x8x8xf32, #tpu.memory_space<vmem>>, vector<1x1x8x8xf32>
    %96 = vector.shape_cast %95 : vector<1x1x8x8xf32> to vector<1x8x8xf32>
    %97 = vector.shape_cast %94 : vector<1x8x8xf32> to vector<1x1x8x8xf32>
    tpu.vector_store %arg7[%c0_39, %c3, %c0_40, %c0_41], %97 {strides = array<i32>} : memref<1x8x8x8xf32, #tpu.memory_space<vmem>>, vector<1x1x8x8xf32>,
    %98 = arith.truncf %94 : vector<1x8x8xf32> to vector<1x8x8xbf16>
    "tpu.trace_start"() <{level = 10 : i32, message = "bqk,bkd->bqd"}> : () -> ()
    %cst_42 = arith.constant dense<0.000000e+00> : vector<1x8x32xf32>
    %99 = tpu.matmul %98, %83, %cst_42 {dimension_numbers = #tpu.dot_dimension_numbers<[2], [1], [1], [2], [0, 0, 0, 1, 1, 2], [0], [0]>} : vector<1x8x8xbf16>, vector<1x8x32xbf16>, vector<1x8x32xf32> -> vector<1x8x32xf32>
    "tpu.trace_stop"() : () -> ()
    %c0_43 = arith.constant 0 : index
    %c0_44 = arith.constant 0 : index
    %c96 = arith.constant 96 : index
    %100 = vector.load %arg8[%c0_43, %c0_44, %c96] : memref<1x8x256xf32, #tpu.memory_space<vmem>>, vector<1x8x32xf32>
    tpu.vector_store %arg8[%c0_43, %c0_44, %c96], %99 {strides = array<i32>} : memref<1x8x256xf32, #tpu.memory_space<vmem>>, vector<1x8x32xf32>,
    %101 = vector.extract_strided_slice %14 {offsets = [0, 0, 128], sizes = [1, 8, 32], strides = [1, 1, 1]} : vector<1x8x256xbf16> to vector<1x8x32xbf16>
    %102 = vector.extract_strided_slice %17 {offsets = [0, 0, 128], sizes = [1, 8, 32], strides = [1, 1, 1]} : vector<1x8x256xbf16> to vector<1x8x32xbf16>
    %103 = vector.extract_strided_slice %20 {offsets = [0, 0, 128], sizes = [1, 8, 32], strides = [1, 1, 1]} : vector<1x8x256xbf16> to vector<1x8x32xbf16>
    "tpu.trace_start"() <{level = 10 : i32, message = "bqd,bkd->bqk"}> : () -> ()
    %cst_45 = arith.constant dense<0.000000e+00> : vector<1x8x8xf32>
    %104 = tpu.matmul %101, %102, %cst_45 {dimension_numbers = #tpu.dot_dimension_numbers<[2], [2], [1], [1], [0, 0, 0, 1, 1, 1], [0], [0]>} : vector<1x8x32xbf16>, vector<1x8x32xbf16>, vector<1x8x8xf32> -> vector<1x8x8xf32>
    "tpu.trace_stop"() : () -> ()
    %cst_46 = arith.constant dense<0xFF800000> : vector<1x8xf32>
    %105 = vector.multi_reduction <maximumf>, %104, %cst_46 [2] : vector<1x8x8xf32> to vector<1x8xf32>
    %106 = vector.shape_cast %105 : vector<1x8xf32> to vector<1x8x1xf32>
    %107 = vector.broadcast %106 : vector<1x8x1xf32> to vector<1x8x8xf32>
    %108 = arith.subf %104, %107 : vector<1x8x8xf32>
    %109 = math.exp %108 : vector<1x8x8xf32>
    %cst_47 = arith.constant dense<0.000000e+00> : vector<1x8xf32>
    %110 = vector.multi_reduction <add>, %109, %cst_47 [2] : vector<1x8x8xf32> to vector<1x8xf32>
    %111 = vector.shape_cast %110 : vector<1x8xf32> to vector<1x8x1xf32>
    %112 = tpu.reciprocal %111 {approx = true} : vector<1x8x1xf32> -> vector<1x8x1xf32>
    %113 = vector.broadcast %112 : vector<1x8x1xf32> to vector<1x8x8xf32>
    %114 = arith.mulf %109, %113 : vector<1x8x8xf32>
    %c0_48 = arith.constant 0 : index
    %c4 = arith.constant 4 : index
    %c0_49 = arith.constant 0 : index
    %c0_50 = arith.constant 0 : index
    %115 = vector.load %arg7[%c0_48, %c4, %c0_49, %c0_50] : memref<1x8x8x8xf32, #tpu.memory_space<vmem>>, vector<1x1x8x8xf32>
    %116 = vector.shape_cast %115 : vector<1x1x8x8xf32> to vector<1x8x8xf32>
    %117 = vector.shape_cast %114 : vector<1x8x8xf32> to vector<1x1x8x8xf32>
    tpu.vector_store %arg7[%c0_48, %c4, %c0_49, %c0_50], %117 {strides = array<i32>} : memref<1x8x8x8xf32, #tpu.memory_space<vmem>>, vector<1x1x8x8xf32>,
    %118 = arith.truncf %114 : vector<1x8x8xf32> to vector<1x8x8xbf16>
    "tpu.trace_start"() <{level = 10 : i32, message = "bqk,bkd->bqd"}> : () -> ()
    %cst_51 = arith.constant dense<0.000000e+00> : vector<1x8x32xf32>
    %119 = tpu.matmul %118, %103, %cst_51 {dimension_numbers = #tpu.dot_dimension_numbers<[2], [1], [1], [2], [0, 0, 0, 1, 1, 2], [0], [0]>} : vector<1x8x8xbf16>, vector<1x8x32xbf16>, vector<1x8x32xf32> -> vector<1x8x32xf32>
    "tpu.trace_stop"() : () -> ()
    %c0_52 = arith.constant 0 : index
    %c0_53 = arith.constant 0 : index
    %c128 = arith.constant 128 : index
    %120 = vector.load %arg8[%c0_52, %c0_53, %c128] : memref<1x8x256xf32, #tpu.memory_space<vmem>>, vector<1x8x32xf32>
    tpu.vector_store %arg8[%c0_52, %c0_53, %c128], %119 {strides = array<i32>} : memref<1x8x256xf32, #tpu.memory_space<vmem>>, vector<1x8x32xf32>,
    %121 = vector.extract_strided_slice %14 {offsets = [0, 0, 160], sizes = [1, 8, 32], strides = [1, 1, 1]} : vector<1x8x256xbf16> to vector<1x8x32xbf16>
    %122 = vector.extract_strided_slice %17 {offsets = [0, 0, 160], sizes = [1, 8, 32], strides = [1, 1, 1]} : vector<1x8x256xbf16> to vector<1x8x32xbf16>
    %123 = vector.extract_strided_slice %20 {offsets = [0, 0, 160], sizes = [1, 8, 32], strides = [1, 1, 1]} : vector<1x8x256xbf16> to vector<1x8x32xbf16>
    "tpu.trace_start"() <{level = 10 : i32, message = "bqd,bkd->bqk"}> : () -> ()
    %cst_54 = arith.constant dense<0.000000e+00> : vector<1x8x8xf32>
    %124 = tpu.matmul %121, %122, %cst_54 {dimension_numbers = #tpu.dot_dimension_numbers<[2], [2], [1], [1], [0, 0, 0, 1, 1, 1], [0], [0]>} : vector<1x8x32xbf16>, vector<1x8x32xbf16>, vector<1x8x8xf32> -> vector<1x8x8xf32>
    "tpu.trace_stop"() : () -> ()
    %cst_55 = arith.constant dense<0xFF800000> : vector<1x8xf32>
    %125 = vector.multi_reduction <maximumf>, %124, %cst_55 [2] : vector<1x8x8xf32> to vector<1x8xf32>
    %126 = vector.shape_cast %125 : vector<1x8xf32> to vector<1x8x1xf32>
    %127 = vector.broadcast %126 : vector<1x8x1xf32> to vector<1x8x8xf32>
    %128 = arith.subf %124, %127 : vector<1x8x8xf32>
    %129 = math.exp %128 : vector<1x8x8xf32>
    %cst_56 = arith.constant dense<0.000000e+00> : vector<1x8xf32>
    %130 = vector.multi_reduction <add>, %129, %cst_56 [2] : vector<1x8x8xf32> to vector<1x8xf32>
    %131 = vector.shape_cast %130 : vector<1x8xf32> to vector<1x8x1xf32>
    %132 = tpu.reciprocal %131 {approx = true} : vector<1x8x1xf32> -> vector<1x8x1xf32>
    %133 = vector.broadcast %132 : vector<1x8x1xf32> to vector<1x8x8xf32>
    %134 = arith.mulf %129, %133 : vector<1x8x8xf32>
    %c0_57 = arith.constant 0 : index
    %c5 = arith.constant 5 : index
    %c0_58 = arith.constant 0 : index
    %c0_59 = arith.constant 0 : index
    %135 = vector.load %arg7[%c0_57, %c5, %c0_58, %c0_59] : memref<1x8x8x8xf32, #tpu.memory_space<vmem>>, vector<1x1x8x8xf32>
    %136 = vector.shape_cast %135 : vector<1x1x8x8xf32> to vector<1x8x8xf32>
    %137 = vector.shape_cast %134 : vector<1x8x8xf32> to vector<1x1x8x8xf32>
    tpu.vector_store %arg7[%c0_57, %c5, %c0_58, %c0_59], %137 {strides = array<i32>} : memref<1x8x8x8xf32, #tpu.memory_space<vmem>>, vector<1x1x8x8xf32>,
    %138 = arith.truncf %134 : vector<1x8x8xf32> to vector<1x8x8xbf16>
    "tpu.trace_start"() <{level = 10 : i32, message = "bqk,bkd->bqd"}> : () -> ()
    %cst_60 = arith.constant dense<0.000000e+00> : vector<1x8x32xf32>
    %139 = tpu.matmul %138, %123, %cst_60 {dimension_numbers = #tpu.dot_dimension_numbers<[2], [1], [1], [2], [0, 0, 0, 1, 1, 2], [0], [0]>} : vector<1x8x8xbf16>, vector<1x8x32xbf16>, vector<1x8x32xf32> -> vector<1x8x32xf32>
    "tpu.trace_stop"() : () -> ()
    %c0_61 = arith.constant 0 : index
    %c0_62 = arith.constant 0 : index
    %c160 = arith.constant 160 : index
    %140 = vector.load %arg8[%c0_61, %c0_62, %c160] : memref<1x8x256xf32, #tpu.memory_space<vmem>>, vector<1x8x32xf32>
    tpu.vector_store %arg8[%c0_61, %c0_62, %c160], %139 {strides = array<i32>} : memref<1x8x256xf32, #tpu.memory_space<vmem>>, vector<1x8x32xf32>,
    %141 = vector.extract_strided_slice %14 {offsets = [0, 0, 192], sizes = [1, 8, 32], strides = [1, 1, 1]} : vector<1x8x256xbf16> to vector<1x8x32xbf16>
    %142 = vector.extract_strided_slice %17 {offsets = [0, 0, 192], sizes = [1, 8, 32], strides = [1, 1, 1]} : vector<1x8x256xbf16> to vector<1x8x32xbf16>
    %143 = vector.extract_strided_slice %20 {offsets = [0, 0, 192], sizes = [1, 8, 32], strides = [1, 1, 1]} : vector<1x8x256xbf16> to vector<1x8x32xbf16>
    "tpu.trace_start"() <{level = 10 : i32, message = "bqd,bkd->bqk"}> : () -> ()
    %cst_63 = arith.constant dense<0.000000e+00> : vector<1x8x8xf32>
    %144 = tpu.matmul %141, %142, %cst_63 {dimension_numbers = #tpu.dot_dimension_numbers<[2], [2], [1], [1], [0, 0, 0, 1, 1, 1], [0], [0]>} : vector<1x8x32xbf16>, vector<1x8x32xbf16>, vector<1x8x8xf32> -> vector<1x8x8xf32>
    "tpu.trace_stop"() : () -> ()
    %cst_64 = arith.constant dense<0xFF800000> : vector<1x8xf32>
    %145 = vector.multi_reduction <maximumf>, %144, %cst_64 [2] : vector<1x8x8xf32> to vector<1x8xf32>
    %146 = vector.shape_cast %145 : vector<1x8xf32> to vector<1x8x1xf32>
    %147 = vector.broadcast %146 : vector<1x8x1xf32> to vector<1x8x8xf32>
    %148 = arith.subf %144, %147 : vector<1x8x8xf32>
    %149 = math.exp %148 : vector<1x8x8xf32>
    %cst_65 = arith.constant dense<0.000000e+00> : vector<1x8xf32>
    %150 = vector.multi_reduction <add>, %149, %cst_65 [2] : vector<1x8x8xf32> to vector<1x8xf32>
    %151 = vector.shape_cast %150 : vector<1x8xf32> to vector<1x8x1xf32>
    %152 = tpu.reciprocal %151 {approx = true} : vector<1x8x1xf32> -> vector<1x8x1xf32>
    %153 = vector.broadcast %152 : vector<1x8x1xf32> to vector<1x8x8xf32>
    %154 = arith.mulf %149, %153 : vector<1x8x8xf32>
    %c0_66 = arith.constant 0 : index
    %c6 = arith.constant 6 : index
    %c0_67 = arith.constant 0 : index
    %c0_68 = arith.constant 0 : index
    %155 = vector.load %arg7[%c0_66, %c6, %c0_67, %c0_68] : memref<1x8x8x8xf32, #tpu.memory_space<vmem>>, vector<1x1x8x8xf32>
    %156 = vector.shape_cast %155 : vector<1x1x8x8xf32> to vector<1x8x8xf32>
    %157 = vector.shape_cast %154 : vector<1x8x8xf32> to vector<1x1x8x8xf32>
    tpu.vector_store %arg7[%c0_66, %c6, %c0_67, %c0_68], %157 {strides = array<i32>} : memref<1x8x8x8xf32, #tpu.memory_space<vmem>>, vector<1x1x8x8xf32>,
    %158 = arith.truncf %154 : vector<1x8x8xf32> to vector<1x8x8xbf16>
    "tpu.trace_start"() <{level = 10 : i32, message = "bqk,bkd->bqd"}> : () -> ()
    %cst_69 = arith.constant dense<0.000000e+00> : vector<1x8x32xf32>
    %159 = tpu.matmul %158, %143, %cst_69 {dimension_numbers = #tpu.dot_dimension_numbers<[2], [1], [1], [2], [0, 0, 0, 1, 1, 2], [0], [0]>} : vector<1x8x8xbf16>, vector<1x8x32xbf16>, vector<1x8x32xf32> -> vector<1x8x32xf32>
    "tpu.trace_stop"() : () -> ()
    %c0_70 = arith.constant 0 : index
    %c0_71 = arith.constant 0 : index
    %c192 = arith.constant 192 : index
    %160 = vector.load %arg8[%c0_70, %c0_71, %c192] : memref<1x8x256xf32, #tpu.memory_space<vmem>>, vector<1x8x32xf32>
    tpu.vector_store %arg8[%c0_70, %c0_71, %c192], %159 {strides = array<i32>} : memref<1x8x256xf32, #tpu.memory_space<vmem>>, vector<1x8x32xf32>,
    %161 = vector.extract_strided_slice %14 {offsets = [0, 0, 224], sizes = [1, 8, 32], strides = [1, 1, 1]} : vector<1x8x256xbf16> to vector<1x8x32xbf16>
    %162 = vector.extract_strided_slice %17 {offsets = [0, 0, 224], sizes = [1, 8, 32], strides = [1, 1, 1]} : vector<1x8x256xbf16> to vector<1x8x32xbf16>
    %163 = vector.extract_strided_slice %20 {offsets = [0, 0, 224], sizes = [1, 8, 32], strides = [1, 1, 1]} : vector<1x8x256xbf16> to vector<1x8x32xbf16>
    "tpu.trace_start"() <{level = 10 : i32, message = "bqd,bkd->bqk"}> : () -> ()
    %cst_72 = arith.constant dense<0.000000e+00> : vector<1x8x8xf32>
    %164 = tpu.matmul %161, %162, %cst_72 {dimension_numbers = #tpu.dot_dimension_numbers<[2], [2], [1], [1], [0, 0, 0, 1, 1, 1], [0], [0]>} : vector<1x8x32xbf16>, vector<1x8x32xbf16>, vector<1x8x8xf32> -> vector<1x8x8xf32>
    "tpu.trace_stop"() : () -> ()
    %cst_73 = arith.constant dense<0xFF800000> : vector<1x8xf32>
    %165 = vector.multi_reduction <maximumf>, %164, %cst_73 [2] : vector<1x8x8xf32> to vector<1x8xf32>
    %166 = vector.shape_cast %165 : vector<1x8xf32> to vector<1x8x1xf32>
    %167 = vector.broadcast %166 : vector<1x8x1xf32> to vector<1x8x8xf32>
    %168 = arith.subf %164, %167 : vector<1x8x8xf32>
    %169 = math.exp %168 : vector<1x8x8xf32>
    %cst_74 = arith.constant dense<0.000000e+00> : vector<1x8xf32>
    %170 = vector.multi_reduction <add>, %169, %cst_74 [2] : vector<1x8x8xf32> to vector<1x8xf32>
    %171 = vector.shape_cast %170 : vector<1x8xf32> to vector<1x8x1xf32>
    %172 = tpu.reciprocal %171 {approx = true} : vector<1x8x1xf32> -> vector<1x8x1xf32>
    %173 = vector.broadcast %172 : vector<1x8x1xf32> to vector<1x8x8xf32>
    %174 = arith.mulf %169, %173 : vector<1x8x8xf32>
    %c0_75 = arith.constant 0 : index
    %c7 = arith.constant 7 : index
    %c0_76 = arith.constant 0 : index
    %c0_77 = arith.constant 0 : index
    %175 = vector.load %arg7[%c0_75, %c7, %c0_76, %c0_77] : memref<1x8x8x8xf32, #tpu.memory_space<vmem>>, vector<1x1x8x8xf32>
    %176 = vector.shape_cast %175 : vector<1x1x8x8xf32> to vector<1x8x8xf32>
    %177 = vector.shape_cast %174 : vector<1x8x8xf32> to vector<1x1x8x8xf32>
    tpu.vector_store %arg7[%c0_75, %c7, %c0_76, %c0_77], %177 {strides = array<i32>} : memref<1x8x8x8xf32, #tpu.memory_space<vmem>>, vector<1x1x8x8xf32>,
    %178 = arith.truncf %174 : vector<1x8x8xf32> to vector<1x8x8xbf16>
    "tpu.trace_start"() <{level = 10 : i32, message = "bqk,bkd->bqd"}> : () -> ()
    %cst_78 = arith.constant dense<0.000000e+00> : vector<1x8x32xf32>
    %179 = tpu.matmul %178, %163, %cst_78 {dimension_numbers = #tpu.dot_dimension_numbers<[2], [1], [1], [2], [0, 0, 0, 1, 1, 2], [0], [0]>} : vector<1x8x8xbf16>, vector<1x8x32xbf16>, vector<1x8x32xf32> -> vector<1x8x32xf32>
    "tpu.trace_stop"() : () -> ()
    %c0_79 = arith.constant 0 : index
    %c0_80 = arith.constant 0 : index
    %c224 = arith.constant 224 : index
    %180 = vector.load %arg8[%c0_79, %c0_80, %c224] : memref<1x8x256xf32, #tpu.memory_space<vmem>>, vector<1x8x32xf32>
    tpu.vector_store %arg8[%c0_79, %c0_80, %c224], %179 {strides = array<i32>} : memref<1x8x256xf32, #tpu.memory_space<vmem>>, vector<1x8x32xf32>,
    %c0_81 = arith.constant 0 : index
    %c0_82 = arith.constant 0 : index
    %c0_83 = arith.constant 0 : index
    %181 = vector.load %arg8[%c0_81, %c0_82, %c0_83] : memref<1x8x256xf32, #tpu.memory_space<vmem>>, vector<1x8x256xf32>
    %182 = vector.shape_cast %181 : vector<1x8x256xf32> to vector<8x256xf32>
    %183 = arith.truncf %182 : vector<8x256xf32> to vector<8x256xbf16>
    %c0_84 = arith.constant 0 : index
    %c0_85 = arith.constant 0 : index
    %184 = vector.load %arg3[%c0_84, %c0_85] : memref<256x256xbf16, #tpu.memory_space<vmem>>, vector<256x256xbf16>
    %cst_86 = arith.constant dense<0.000000e+00> : vector<8x256xf32>
    %185 = tpu.matmul %183, %184, %cst_86 {dimension_numbers = #tpu.dot_dimension_numbers<[1], [0], [0], [1], [0, 0, 1, 1], [], []>} : vector<8x256xbf16>, vector<256x256xbf16>, vector<8x256xf32> -> vector<8x256xf32>
    %c0_87 = arith.constant 0 : index
    %c0_88 = arith.constant 0 : index
    %186 = vector.load %arg5[%c0_87, %c0_88] : memref<1x256xf32, #tpu.memory_space<vmem>>, vector<1x256xf32>
    %187 = vector.shape_cast %186 : vector<1x256xf32> to vector<256xf32>
    %188 = vector.shape_cast %187 : vector<256xf32> to vector<1x256xf32>
    %189 = vector.broadcast %188 : vector<1x256xf32> to vector<8x256xf32>
    %190 = arith.addf %185, %189 : vector<8x256xf32>
    %191 = vector.shape_cast %190 : vector<8x256xf32> to vector<1x8x256xf32>
    %c0_89 = arith.constant 0 : index
    %c0_90 = arith.constant 0 : index
    %c0_91 = arith.constant 0 : index
    %192 = vector.load %arg6[%c0_89, %c0_90, %c0_91] : memref<1x8x256xf32, #tpu.memory_space<vmem>>, vector<1x8x256xf32>
    tpu.vector_store %arg6[%c0_89, %c0_90, %c0_91], %191 {strides = array<i32>} : memref<1x8x256xf32, #tpu.memory_space<vmem>>, vector<1x8x256xf32>,
    return
  }
  func.func @transform_0(%arg0: i32) -> (i32, i32, i32) {
    %c0_i32 = arith.constant 0 : i32
    %c0_i32_0 = arith.constant 0 : i32
    %c0_i32_1 = arith.constant 0 : i32
    return %arg0, %c0_i32, %c0_i32_0 : i32, i32, i32
  }
  func.func @transform_1(%arg0: i32) -> (i32, i32) {
    %c0_i32 = arith.constant 0 : i32
    %c0_i32_0 = arith.constant 0 : i32
    %c0_i32_1 = arith.constant 0 : i32
    return %c0_i32, %c0_i32_0 : i32, i32
  }
  func.func @transform_2(%arg0: i32) -> (i32, i32) {
    %c0_i32 = arith.constant 0 : i32
    %c0_i32_0 = arith.constant 0 : i32
    %c0_i32_1 = arith.constant 0 : i32
    return %c0_i32, %c0_i32_0 : i32, i32
  }
  func.func @transform_3(%arg0: i32) -> (i32, i32) {
    %c0_i32 = arith.constant 0 : i32
    %c0_i32_0 = arith.constant 0 : i32
    %c0_i32_1 = arith.constant 0 : i32
    return %c0_i32, %c0_i32_0 : i32, i32
  }
  func.func @transform_4(%arg0: i32) -> (i32, i32) {
    %c0_i32 = arith.constant 0 : i32
    %c0_i32_0 = arith.constant 0 : i32
    %c0_i32_1 = arith.constant 0 : i32
    return %c0_i32, %c0_i32_0 : i32, i32
  }
  func.func @transform_5(%arg0: i32) -> (i32, i32, i32) {
    %c0_i32 = arith.constant 0 : i32
    %c0_i32_0 = arith.constant 0 : i32
    %c0_i32_1 = arith.constant 0 : i32
    return %arg0, %c0_i32, %c0_i32_0 : i32, i32, i32
  }
  func.func @transform_6(%arg0: i32) -> (i32, i32, i32, i32) {
    %c0_i32 = arith.constant 0 : i32
    %c0_i32_0 = arith.constant 0 : i32
    %c0_i32_1 = arith.constant 0 : i32
    %c0_i32_2 = arith.constant 0 : i32
    return %arg0, %c0_i32, %c0_i32_0, %c0_i32_1 : i32, i32, i32, i32
  }
}

</mosaic_0001>

<bundles_post_ra>
// kernel: tpu_custom_call.1
= control target key start
LH: loop header
LB: loop body
LE: loop exit
PB: predicated region body
PF: predicated region fallthrough
CT: control target
= control target key end

     0   :  { %12 = vsyncpa [#allocation4], 0  ;;  %s3744_s0 = inlined_call_operand.hbm [shape: f32[2,8,256], index: 0, kind: input, shape index: {}]   ;;  %s3745_s1 = inlined_call_operand.hbm [shape: bf16[256,768], index: 1, kind: input, shape index: {}]   ;;  %s3746_s2 = inlined_call_operand.hbm [shape: bf16[256,256], index: 2, kind: input, shape index: {}]   ;;  %s3747_s3 = inlined_call_operand.vmem [shape: f32[1,768], index: 3, kind: input, shape index: {}]   ;;  %s3748_s4 = inlined_call_operand.vmem [shape: f32[1,256], index: 4, kind: input, shape index: {}]   ;;  %s3749_s5 = inlined_call_operand.hbm [shape: f32[2,8,256], index: 5, kind: output, shape index: {0}]   ;;  %s3750_s6 = inlined_call_operand.hbm [shape: f32[2,8,8,8], index: 6, kind: output, shape index: {1}]  }
   0x1   :  { %14 = vsyncpa [#allocation4 + $0x1], 0 }
   0x2   :  { %15 = vsyncpa [#allocation7], 0 }
   0x3   :  { %16 = vsyncpa [#allocation5], 0 }
   0x4   :  { %18 = vsyncpa [#allocation5 + $0x1], 0 }
   0x5   :  { %19 = vsyncpa [#allocation11], 0 }
   0x6   :  { %21 = vsyncpa [#allocation11 + $0x1], 0  ;;  %s3239_s21 = smov 0   ;;  %s3241_s22 = smov 0  }
   0x7   :  { %s3243_s23 = smov 0   ;;  %s3245_s24 = smov 0  }
   0x8 LB: > { %s3260_s25 = sadd.s32 4294967295, %s3186_s24   ;;  %s2387_s26 = sadd.s32 4294967294, %s3186_s24   ;;  %s3186_s24 = sphi %s3245_s24, %s3770_s24   ;;  %s3182_s23 = sphi %s3243_s23, %s3769_s23   ;;  %s3178_s22 = sphi %s3241_s22, %s3768_s22   ;;  %s3174_s21 = sphi %s3239_s21, %s3767_s21  }
   0x9   : > { %p47_p0 = scmp.ne.s32.totalorder %s3178_s22, %s3174_s21  ;;  %p3751_p1 = scmp.eq.s32.totalorder %s3260_s25, 0 }
   0xa   : > { %p161_p3 = scmp.eq.s32.totalorder %s2387_s26, 1  ;;  %p2388_p5 = scmp.ge.s32.totalorder %s3186_s24, 1 }
   0xb   : > { %p3269_p4 = por %p3751_p1, %p47_p0  ;;  %p194_p7 = scmp.lt.s32.totalorder %s3186_s24, 3 }
   0xc   : > { %p3274_p6 = por %p161_p3, %p47_p0  ;;  %s3188_s30 = smov [#allocation6]  }
   0xd   : > { %s3754_s27 = scalar_select %p3269_p4, 1, 0 }
   0xe   : > { %s3755_s28 = scalar_select %p3274_p6, 1, 0 }
   0xf   : > { %p3279_p8 = pnand %p2388_p5, %p194_p7  ;;  %s206_s7 = sshll.u32 %s3188_s30, 4  ;;  %s3283_s7 = int_to_ptr.vmem [resolvable:$true] %s206_s7 }
  0x10   : > { %s3189_s9 = smov [#allocation8]   ;;  %s2998_s13 = scalar_lea.hbm %s3745_s1, 12288 }
  0x11   : > { %p2705_p9 = pneg %p3279_p8  ;;  %s219_s10 = sshll.u32 %s3189_s9, 4  ;;  %s3294_s10 = int_to_ptr.vmem [resolvable:$true] %s219_s10 }
  0x12   : > { %p2999_p12 = scmp.ne.s32.totalorder %s3745_s1, %s2998_s13  ;;  %p3005_p5 = scmp.lt.u32.totalorder %s2998_s13, %s3745_s1 }
  0x13   : > { %p3290_p11 = pnand %p2705_p9, %p3751_p1 }
  0x15   : > { %p3000_p13 = pneg %p3290_p11 }
  0x17   : > { %p3001_p0 = pnand %p3000_p13, %p2999_p12 }
  0x19   : > { %p3002_p3 = pneg %p3001_p0 }
  0x1b   : > { %p3007_p7 = pnand %p3005_p5, %p3002_p3 }
  0x1d   : > { %3010 = shalt.err (!%p3007_p7)
}
  0x1e   : > { %s3011_s18 = scalar_lea.vmem %s3283_s7, 12288  ;;  %p3019_p2 = scmp.lt.s32.totalorder %s3283_s7, %s3283_s7 }
  0x1f   : > { %p3012_p9 = scmp.ne.s32.totalorder %s3283_s7, %s3011_s18  ;;  %p3020_p12 = scmp.lt.s32.totalorder %s3011_s18, %s3011_s18 }
  0x21   : > { %p3014_p10 = pnand %p3012_p9, %p3000_p13  ;;  %p3021_p0 = por %p3020_p12, %p3019_p2 }
  0x23   : > { %p3015_p1 = pneg %p3014_p10 }
  0x25   : > { %p3022_p6 = pnand %p3021_p0, %p3015_p1 }
  0x27   : > { %3025 = shalt.err (!%p3022_p6)
}
  0x28   : > { %s3190_s19 = smov 384   ;;  %s3191_s20 = smov 24  }
  0x29   : > { %2708 = dma.hbm_to_vmem [thread:$0]  (!%p3290_p11), %s3745_s1, 12288, %s3283_s7, [#allocation7], %s3190_s19, %s3190_s19, %s3191_s20  }
  0x2a   : > { %s3026_s12 = scalar_lea.hbm %s3746_s2, 4096 }
  0x2b   : > { %p3027_p2 = scmp.ne.s32.totalorder %s3746_s2, %s3026_s12  ;;  %p3033_p10 = scmp.lt.u32.totalorder %s3026_s12, %s3746_s2 }
  0x2d   : > { %p3029_p1 = pnand %p3027_p2, %p3000_p13 }
  0x2f   : > { %p3030_p6 = pneg %p3029_p1 }
  0x31   : > { %p3035_p3 = pnand %p3033_p10, %p3030_p6 }
  0x33   : > { %3038 = shalt.err (!%p3035_p3)
}
  0x34   : > { %s3039_s7 = scalar_lea.vmem %s3294_s10, 4096  ;;  %p3047_p12 = scmp.lt.s32.totalorder %s3294_s10, %s3294_s10 }
  0x35   : > { %p3040_p5 = scmp.ne.s32.totalorder %s3294_s10, %s3039_s7  ;;  %p3048_p0 = scmp.lt.s32.totalorder %s3039_s7, %s3039_s7 }
  0x37   : > { %p3042_p7 = pnand %p3040_p5, %p3000_p13  ;;  %p3049_p2 = por %p3048_p0, %p3047_p12 }
  0x39   : > { %p3043_p9 = pneg %p3042_p7 }
  0x3b   : > { %p3050_p1 = pnand %p3049_p2, %p3043_p9 }
  0x3d   : > { %3053 = shalt.err (!%p3050_p1)
}
  0x3e   : > { %s3192_s17 = smov 128   ;;  %s3193_s18 = smov 8  }
  0x3f   : > { %2711 = dma.hbm_to_vmem [thread:$0]  (!%p3290_p11), %s3746_s2, 4096, %s3294_s10, [#allocation7], %s3192_s17, %s3192_s17, %s3193_s18  }
  0x40   : > { %s3349_s26 = sadd.s32 1, %s3186_s24   ;;  %s34_s9 = sadd.s32 1, %s3182_s23 }
  0x41   : > { %s31_s30 = ssub.s32 %s3186_s24, %s3349_s26  ;;  %p41_p6 = scmp.ne.s32.totalorder %s3182_s23, %s3178_s22 }
  0x42   : > { %p32_p13 = scmp.eq.s32.totalorder %s31_s30, 0  ;;  %p42_p10 = scmp.eq.s32.totalorder %s3186_s24, 0 }
  0x43   : > { %p3758_p5 = scmp.eq.s32.totalorder %s3260_s25, 1  ;;  %p2725_p9 = scmp.lt.s32.totalorder %s3186_s24, 2 }
  0x44   : > { %s3358_s11 = scalar_select %p32_p13, %s3182_s23, %s34_s9  }
  0x45   : > { %p43_p3 = por %p42_p10, %p41_p6  ;;  %p3362_p7 = por %p3758_p5, %p41_p6 }
  0x46   : > { %s239_s8 = sand.u32 1, %s3182_s23   ;;  %s2560_s10 = sshll.u32 %s3186_s24, 8 }
  0x47   : > { %s3759_s12 = scalar_select %p3362_p7, 1, 0 }
  0x48   : > { %s2392_s13 = sshll.u32 %s239_s8, 4  ;;  %s3372_s16 = scalar_lea.hbm %s3744_s0, %s2560_s10 }
  0x49   : > { %s243_s7 = scalar_lea.vmem [#allocation3], %s2392_s13  ;;  %p3376_p11 = pnand %p2725_p9, %p43_p3 }
  0x4a   : > { %s251_s17 = sshll.u32 %s243_s7, 4  ;;  %s240_s19 = scalar_lea.sflag [#allocation4], %s239_s8  ;;  %s3374_s17 = int_to_ptr.vmem [resolvable:$true] %s251_s17 }
  0x4b   : > { %s3054_s20 = scalar_lea.hbm %s3372_s16, 256  ;;  %p3056_p0 = pneg %p3376_p11 }
  0x4c   : > { %p3055_p12 = scmp.ne.s32.totalorder %s3372_s16, %s3054_s20  ;;  %s3059_s13 = scalar_lea.hbm %s3744_s0, 512 }
  0x4d   : > { %p3060_p13 = scmp.lt.u32.totalorder %s3372_s16, %s3744_s0  ;;  %p3061_p6 = scmp.lt.u32.totalorder %s3059_s13, %s3054_s20 }
  0x4e   : > { %p3057_p2 = pnand %p3056_p0, %p3055_p12  ;;  %p3063_p3 = scmp.lt.u32.totalorder %s3054_s20, %s3372_s16 }
  0x4f   : > { %p3062_p10 = por %p3061_p6, %p3060_p13 }
  0x50   : > { %p3058_p1 = pneg %p3057_p2 }
  0x51   : > { %p3064_p5 = por %p3063_p3, %p3062_p10 }
  0x53   : > { %p3065_p9 = pnand %p3064_p5, %p3058_p1 }
  0x55   : > { %3068 = shalt.err (!%p3065_p9)
}
  0x56   : > { %s3069_s8 = scalar_lea.vmem %s3374_s17, 256  ;;  %s3194_s15 = smov [#allocation3]  }
  0x57   : > { %p3070_p12 = scmp.ne.s32.totalorder %s3374_s17, %s3069_s8  ;;  %s3074_s7 = sshll.u32 %s3194_s15, 4  ;;  %s3075_s7 = int_to_ptr.vmem [resolvable:$false] %s3074_s7 }
  0x58   : > { %s3076_s30 = scalar_lea.vmem %s3075_s7, 512  ;;  %p3077_p4 = scmp.lt.s32.totalorder %s3374_s17, %s3075_s7 }
  0x59   : > { %p3072_p2 = pnand %p3070_p12, %p3056_p0  ;;  %p3078_p13 = scmp.lt.s32.totalorder %s3076_s30, %s3069_s8 }
  0x5b   : > { %p3073_p7 = pneg %p3072_p2  ;;  %p3079_p6 = por %p3078_p13, %p3077_p4 }
  0x5d   : > { %p3080_p10 = pnand %p3079_p6, %p3073_p7 }
  0x5f   : > { %3083 = shalt.err (!%p3080_p10)
}
  0x60   : > { %2715 = dma.hbm_to_vmem [thread:$0]  (!%p3376_p11), %s3372_s16, 256, %s3374_s17, %s240_s19  }
  0x61   : > { %260 = sbr.rel (%p3279_p8) target bundleno = 5244 (0x147c), region = 40  ;;  %s3408_s20 = sand.u32 (!%p3279_p8), 1, %s3178_s22  }
  0x62   : > { %s2396_s9 = sshll.u32 (!%p3279_p8), %s3408_s20, 4  ;;  %s263_s13 = scalar_lea.sflag (!%p3279_p8), [#allocation4], %s3408_s20 }
  0x63   : > { %s3414_s10 = scalar_lea.vmem (!%p3279_p8), [#allocation3], %s2396_s9  ;;  %p3761_p4 = scmp.ne.s32.totalorder (!%p3279_p8), %s3754_s27, 0 }
  0x68   : > { %3157 = dma.done.wait (%p3761_p4), %s263_s13, 256  }
  0x69   : > { %3159 = vsyncadd (%p3761_p4), %s263_s13, 4294967040  ;;  %p3762_p7 = scmp.eq.s32.totalorder %s3260_s25, 0 }
  0x6b   : > { %3161 = dma.done.wait (%p3762_p7), [#allocation7], 16384   ;;  %p3763_p8 = pmov %p3762_p7 }
  0x6c   : > { %v2774_v0 = vld [vmem:[#allocation6 + $0xc] ss:$24 sps:$4 sm:$0xff]   ;;  %v2776_v1 = vld [vmem:[#allocation6 + $0x8] ss:$24 sps:$4 sm:$0xff]   ;;  %v2779_v3 = vld [vmem:[#allocation6 + $0x3c] ss:$24 sps:$4 sm:$0xff]  }
  0x6d   : > { %3163 = vsyncadd (%p3763_p8), [#allocation7], 4294950912  ;;  %962 = vmatprep.subr.bf16.mxu1 %v2774_v0  ;;  %v2777_v2 = vld [vmem:[#allocation6 + $0x4] ss:$24 sps:$4 sm:$0xff]   ;;  %v2781_v4 = vld [vmem:[#allocation6] ss:$24 sps:$4 sm:$0xff]  }
  0x6e   : > { %963 = vmatpush1.bf16.msra.mxu1 %v2776_v1  ;;  %v2782_v5 = vld [vmem:[#allocation6 + $0x38] ss:$24 sps:$4 sm:$0xff]   ;;  %921 = vmatprep.subr.bf16.mxu0 %v2777_v2  ;;  %v2783_v6 = vld [vmem:[#allocation6 + $0x34] ss:$24 sps:$4 sm:$0xff]   ;;  %v2788_v9 = vld [vmem:[#allocation6 + $0x68] ss:$24 sps:$4 sm:$0xff]  }
  0x6f   : > { %964 = vmatprep.subr.bf16.mxu1 %v2779_v3  ;;  %922 = vmatpush1.bf16.msra.mxu0 %v2781_v4  ;;  %v2785_v7 = vld [vmem:[#allocation6 + $0x6c] ss:$24 sps:$4 sm:$0xff]   ;;  %v2787_v8 = vld [vmem:[#allocation6 + $0x30] ss:$24 sps:$4 sm:$0xff]   ;;  %v2791_v11 = vld [vmem:[#allocation6 + $0x9c] ss:$24 sps:$4 sm:$0xff]  }
  0x70   : > { %923 = vmatprep.subr.bf16.mxu0 %v2783_v6  ;;  %v2789_v10 = vld [vmem:[#allocation6 + $0x64] ss:$24 sps:$4 sm:$0xff]   ;;  %v2793_v12 = vld [vmem:[#allocation6 + $0x60] ss:$24 sps:$4 sm:$0xff]   ;;  %v2795_v13 = vld [vmem:[#allocation6 + $0x94] ss:$24 sps:$4 sm:$0xff]  }
  0x71   : > { %v2794_v14 = vld [vmem:[#allocation6 + $0x98] ss:$24 sps:$4 sm:$0xff]   ;;  %v2797_v15 = vld [vmem:[#allocation6 + $0xcc] ss:$24 sps:$4 sm:$0xff]   ;;  %v2800_v18 = vld [vmem:[#allocation6 + $0xc8] ss:$24 sps:$4 sm:$0xff]  }
  0x72   : > { %965 = vmatpush1.bf16.msra.mxu1 %v2782_v5  ;;  %v2799_v16 = vld [vmem:[#allocation6 + $0x90] ss:$24 sps:$4 sm:$0xff]   ;;  %v2801_v17 = vld [vmem:[#allocation6 + $0xc4] ss:$24 sps:$4 sm:$0xff]   ;;  %v2805_v20 = vld [vmem:[#allocation6 + $0xc0] ss:$24 sps:$4 sm:$0xff]   ;;  %v411_v5 = vlaneseq }
  0x73   : > { %966 = vmatprep.subr.bf16.mxu1 %v2785_v7  ;;  %924 = vmatpush1.bf16.msra.mxu0 %v2787_v8  ;;  %v2803_v19 = vld [vmem:[#allocation6 + $0xfc] ss:$24 sps:$4 sm:$0xff]   ;;  %v2806_v22 = vld [vmem:[#allocation6 + $0xf8] ss:$24 sps:$4 sm:$0xff]   ;;  %v2809_v23 = vld [vmem:[#allocation6 + $0x12c] ss:$24 sps:$4 sm:$0xff]  }
  0x74   : > { %925 = vmatprep.subr.bf16.mxu0 %v2789_v10  ;;  %v2807_v21 = vld [vmem:[#allocation6 + $0xf4] ss:$24 sps:$4 sm:$0xff]   ;;  %v2811_v24 = vld [vmem:[#allocation6 + $0xf0] ss:$24 sps:$4 sm:$0xff]   ;;  %v2813_v25 = vld [vmem:[#allocation6 + $0x124] ss:$24 sps:$4 sm:$0xff]  }
  0x75   : > { %v2812_v26 = vld [vmem:[#allocation6 + $0x128] ss:$24 sps:$4 sm:$0xff]   ;;  %v2815_v27 = vld [vmem:[#allocation6 + $0x15c] ss:$24 sps:$4 sm:$0xff]   ;;  %v2818_v30 = vld [vmem:[#allocation6 + $0x158] ss:$24 sps:$4 sm:$0xff]  }
  0x76   : > { %967 = vmatpush1.bf16.msra.mxu1 %v2788_v9  ;;  %v2817_v28 = vld [vmem:[#allocation6 + $0x120] ss:$24 sps:$4 sm:$0xff]   ;;  %v2819_v29 = vld [vmem:[#allocation6 + $0x154] ss:$24 sps:$4 sm:$0xff]   ;;  %v2823_v32 = vld [vmem:[#allocation6 + $0x150] ss:$24 sps:$4 sm:$0xff]  }
  0x77   : > { %968 = vmatprep.subr.bf16.mxu1 %v2791_v11  ;;  %926 = vmatpush1.bf16.msra.mxu0 %v2793_v12  ;;  %v2821_v31 = vld [vmem:[#allocation6 + $0x18c] ss:$24 sps:$4 sm:$0xff]   ;;  %v2824_v34 = vld [vmem:[#allocation6 + $0x188] ss:$24 sps:$4 sm:$0xff]   ;;  %v2827_v35 = vld [vmem:[#allocation6 + $0x1bc] ss:$24 sps:$4 sm:$0xff]  }
  0x78   : > { %927 = vmatprep.subr.bf16.mxu0 %v2795_v13  ;;  %v2825_v33 = vld [vmem:[#allocation6 + $0x184] ss:$24 sps:$4 sm:$0xff]   ;;  %v2829_v36 = vld [vmem:[#allocation6 + $0x180] ss:$24 sps:$4 sm:$0xff]   ;;  %v2831_v37 = vld [vmem:[#allocation6 + $0x1b4] ss:$24 sps:$4 sm:$0xff]  }
  0x79   : > { %v2830_v38 = vld [vmem:[#allocation6 + $0x1b8] ss:$24 sps:$4 sm:$0xff]   ;;  %v2833_v39 = vld [vmem:[#allocation6 + $0x1ec] ss:$24 sps:$4 sm:$0xff]   ;;  %v2836_v42 = vld [vmem:[#allocation6 + $0x1e8] ss:$24 sps:$4 sm:$0xff]  }
  0x7a   : > { %969 = vmatpush1.bf16.msra.mxu1 %v2794_v14  ;;  %v2835_v40 = vld [vmem:[#allocation6 + $0x1b0] ss:$24 sps:$4 sm:$0xff]   ;;  %v2837_v41 = vld [vmem:[#allocation6 + $0x1e4] ss:$24 sps:$4 sm:$0xff]   ;;  %v2841_v44 = vld [vmem:[#allocation6 + $0x1e0] ss:$24 sps:$4 sm:$0xff]  }
  0x7b   : > { %970 = vmatprep.subr.bf16.mxu1 %v2797_v15  ;;  %928 = vmatpush1.bf16.msra.mxu0 %v2799_v16  ;;  %v2839_v43 = vld [vmem:[#allocation6 + $0x21c] ss:$24 sps:$4 sm:$0xff]   ;;  %v2842_v46 = vld [vmem:[#allocation6 + $0x218] ss:$24 sps:$4 sm:$0xff]   ;;  %v2845_v49 = vld [vmem:[#allocation6 + $0x24c] ss:$24 sps:$4 sm:$0xff]  }
  0x7c   : > { %929 = vmatprep.subr.bf16.mxu0 %v2801_v17  ;;  %v310_v45 = vld [vmem:[%s3414_s10 + $0x8] sm:$0xff]  ;;  %v309_v1 = vld [vmem:[%s3414_s10] sm:$0xff]  ;;  %v3195_v4 = vmov 0.0   ;;  %vm3196_vm0 = vmmov 0   ;;  %v3433_v6 = vshrl.u32 %v411_v5, 7  ;;  %vm1052_vm1 = vcmask 261120  }
  0x7d   : > { %v2843_v47 = vld [vmem:[#allocation6 + $0x214] ss:$24 sps:$4 sm:$0xff]   ;;  %v312_v48 = vpack.c.bf16 %v310_v45, %v310_v45  ;;  %v2847_v50 = vld [vmem:[#allocation6 + $0x210] ss:$24 sps:$4 sm:$0xff]   ;;  %v2849_v51 = vld [vmem:[#allocation6 + $0x244] ss:$24 sps:$4 sm:$0xff]   ;;  %v3426_v3 = vpack.c.bf16 %v309_v1, %v309_v1 }
  0x7e   : > { %971 = vmatpush1.bf16.msra.mxu1 %v2800_v18  ;;  %v2848_v52 = vld [vmem:[#allocation6 + $0x248] ss:$24 sps:$4 sm:$0xff]   ;;  %v2851_v53 = vld [vmem:[#allocation6 + $0x27c] ss:$24 sps:$4 sm:$0xff]   ;;  %v2854_v56 = vld [vmem:[#allocation6 + $0x278] ss:$24 sps:$4 sm:$0xff]  }
  0x7f   : > { %972 = vmatprep.subr.bf16.mxu1 %v2803_v19  ;;  %930 = vmatpush1.bf16.msra.mxu0 %v2805_v20  ;;  %v2853_v54 = vld [vmem:[#allocation6 + $0x240] ss:$24 sps:$4 sm:$0xff]   ;;  %v2855_v55 = vld [vmem:[#allocation6 + $0x274] ss:$24 sps:$4 sm:$0xff]   ;;  %v2859_v58 = vld [vmem:[#allocation6 + $0x270] ss:$24 sps:$4 sm:$0xff]  }
  0x80   : > { %931 = vmatprep.subr.bf16.mxu0 %v2807_v21  ;;  %994 = vmatprep.mubr.bf16.mxu1 %v312_v48  ;;  %v2857_v57 = vld [vmem:[#allocation6 + $0x2ac] ss:$24 sps:$4 sm:$0xff]   ;;  %v2860_v60 = vld [vmem:[#allocation6 + $0x2a8] ss:$24 sps:$4 sm:$0xff]   ;;  %v2863_v61 = vld [vmem:[#allocation6 + $0x2dc] ss:$24 sps:$4 sm:$0xff]  }
  0x81   : > { %953 = vmatprep.mubr.bf16.mxu0 %v312_v48  ;;  %v2861_v59 = vld [vmem:[#allocation6 + $0x2a4] ss:$24 sps:$4 sm:$0xff]   ;;  %v2865_v62 = vld [vmem:[#allocation6 + $0x2a0] ss:$24 sps:$4 sm:$0xff]   ;;  %v2867_v63 = vld [vmem:[#allocation6 + $0x2d4] ss:$24 sps:$4 sm:$0xff]  }
  0x82   : > { %973 = vmatpush1.bf16.msra.mxu1 %v2806_v22  ;;  %v2866_v0 = vld [vmem:[#allocation6 + $0x2d8] ss:$24 sps:$4 sm:$0xff]   ;;  %v421_v7 = vsub.s32 2, %v3433_v6  ;;  %v413_v9 = vsub.s32 0, %v3433_v6  ;;  %s3197_s16 = smov 96   ;;  %vm1099_vm2 = vcmask 64512  }
  0x83   : > { %974 = vmatprep.subr.bf16.mxu1 %v2809_v23  ;;  %932 = vmatpush1.bf16.msra.mxu0 %v2811_v24  ;;  %v2869_v2 = vld [vmem:[#allocation6 + $0x2d0] ss:$24 sps:$4 sm:$0xff]   ;;  %v2897_v45 = vld [vmem:[#allocation6 + $0x1c0] ss:$24 sps:$4 sm:$0xff]   ;;  %vm1116_vm3 = vcmask 1043456   ;;  %s2400_s17 = sshll.u32 %s3408_s20, 6 }
  0x84   : > { %933 = vmatprep.subr.bf16.mxu0 %v2813_v25  ;;  %v3439_v8 = vld [vmem:[%s3747_s3] sm:$0x3f]  ;;  %s3478_s18 = scalar_lea.vmem [#allocation10], %s2400_s17  ;;  %s3198_s19 = smov 64   ;;  %vm1280_vm4 = vcmask 523520   ;;  %vm1398_vm5 = vcmask 785920  }
  0x85   : > { %v422_v10 = vrot.slane %v3439_v8, %v421_v7  ;;  %v414_v11 = vrot.slane %v3439_v8, %v413_v9  ;;  %s3199_s14 = smov 32   ;;  %vm1516_vm6 = vcmask 1048320   ;;  %s2562_s8 = sshll.u32 %s3260_s25, 10 }
  0x86   : > { %975 = vmatpush1.bf16.msra.mxu1 %v2812_v26  ;;  %v2870_v26 = vld [vmem:[#allocation6 + $0x10] ss:$24 sps:$4 sm:$0xff]   ;;  %s2263_s15 = sshll.u32 %s3478_s18, 4  ;;  %s3659_s13 = scalar_lea.hbm %s3750_s6, %s2562_s8  ;;  %s3661_s15 = int_to_ptr.vmem [resolvable:$true] %s2263_s15 }
  0x87   : > { %976 = vmatprep.subr.bf16.mxu1 %v2815_v27  ;;  %934 = vmatpush1.bf16.msra.mxu0 %v2817_v28  ;;  %v2872_v27 = vld [vmem:[#allocation6 + $0x14] ss:$24 sps:$4 sm:$0xff]   ;;  %v2875_v28 = vld [vmem:[#allocation6 + $0x44] ss:$24 sps:$4 sm:$0xff]   ;;  %s2236_s10 = scalar_lea.sflag [#allocation11], %s3408_s20  ;;  %s3084_s27 = scalar_lea.vmem %s3661_s15, 1024 }
  0x88   : > { %935 = vmatprep.subr.bf16.mxu0 %v2819_v29  ;;  %v2873_v29 = vld [vmem:[#allocation6 + $0x40] ss:$24 sps:$4 sm:$0xff]   ;;  %p3085_p11 = scmp.ne.s32.totalorder %s3661_s15, %s3084_s27  ;;  %p3764_p0 = scmp.ne.s32.totalorder %s3759_s12, 0 }
  0x89   : > { %s3200_s29 = smov [#allocation10]  }
  0x8a   : > { %977 = vmatpush1.bf16.msra.mxu1 %v2818_v30  ;;  %v2878_v30 = vld [vmem:[#allocation6 + $0x74] ss:$24 sps:$4 sm:$0xff]   ;;  %p3086_p1 = pnand %p3085_p11, %p3764_p0 }
  0x8b   : > { %978 = vmatprep.subr.bf16.mxu1 %v2821_v31  ;;  %936 = vmatpush1.bf16.msra.mxu0 %v2823_v32  ;;  %v2876_v31 = vld [vmem:[#allocation6 + $0x70] ss:$24 sps:$4 sm:$0xff]   ;;  %v2881_v32 = vld [vmem:[#allocation6 + $0xa4] ss:$24 sps:$4 sm:$0xff]  }
  0x8c   : > { %937 = vmatprep.subr.bf16.mxu0 %v2825_v33  ;;  %v2879_v33 = vld [vmem:[#allocation6 + $0xa0] ss:$24 sps:$4 sm:$0xff]   ;;  %p3087_p3 = pneg %p3086_p1 }
  0x8e   : > { %979 = vmatpush1.bf16.msra.mxu1 %v2824_v34  ;;  %v2884_v34 = vld [vmem:[#allocation6 + $0xd4] ss:$24 sps:$4 sm:$0xff]  }
  0x8f   : > { %980 = vmatprep.subr.bf16.mxu1 %v2827_v35  ;;  %938 = vmatpush1.bf16.msra.mxu0 %v2829_v36  ;;  %v2882_v35 = vld [vmem:[#allocation6 + $0xd0] ss:$24 sps:$4 sm:$0xff]   ;;  %v2887_v36 = vld [vmem:[#allocation6 + $0x104] ss:$24 sps:$4 sm:$0xff]  }
  0x90   : > { %939 = vmatprep.subr.bf16.mxu0 %v2831_v37  ;;  %v2885_v37 = vld [vmem:[#allocation6 + $0x100] ss:$24 sps:$4 sm:$0xff]  }
  0x92   : > { %981 = vmatpush1.bf16.msra.mxu1 %v2830_v38  ;;  %v2890_v38 = vld [vmem:[#allocation6 + $0x134] ss:$24 sps:$4 sm:$0xff]  }
  0x93   : > { %982 = vmatprep.subr.bf16.mxu1 %v2833_v39  ;;  %940 = vmatpush1.bf16.msra.mxu0 %v2835_v40  ;;  %v2888_v39 = vld [vmem:[#allocation6 + $0x130] ss:$24 sps:$4 sm:$0xff]   ;;  %v2893_v40 = vld [vmem:[#allocation6 + $0x164] ss:$24 sps:$4 sm:$0xff]  }
  0x94   : > { %941 = vmatprep.subr.bf16.mxu0 %v2837_v41  ;;  %v2891_v41 = vld [vmem:[#allocation6 + $0x160] ss:$24 sps:$4 sm:$0xff]  }
  0x96   : > { %983 = vmatpush1.bf16.msra.mxu1 %v2836_v42  ;;  %v2896_v42 = vld [vmem:[#allocation6 + $0x194] ss:$24 sps:$4 sm:$0xff]  }
  0x97   : > { %984 = vmatprep.subr.bf16.mxu1 %v2839_v43  ;;  %942 = vmatpush1.bf16.msra.mxu0 %v2841_v44  ;;  %v2894_v43 = vld [vmem:[#allocation6 + $0x190] ss:$24 sps:$4 sm:$0xff]   ;;  %v2899_v44 = vld [vmem:[#allocation6 + $0x1c4] ss:$24 sps:$4 sm:$0xff]  }
  0x98   : > { %943 = vmatprep.subr.bf16.mxu0 %v2843_v47  ;;  %v2900_v47 = vld [vmem:[#allocation6 + $0x1f0] ss:$24 sps:$4 sm:$0xff]  }
  0x9a   : > { %985 = vmatpush1.bf16.msra.mxu1 %v2842_v46  ;;  %v2902_v46 = vld [vmem:[#allocation6 + $0x1f4] ss:$24 sps:$4 sm:$0xff]  }
  0x9b   : > { %986 = vmatprep.subr.bf16.mxu1 %v2845_v49  ;;  %944 = vmatpush1.bf16.msra.mxu0 %v2847_v50  ;;  %v2903_v49 = vld [vmem:[#allocation6 + $0x220] ss:$24 sps:$4 sm:$0xff]   ;;  %v2908_v50 = vld [vmem:[#allocation6 + $0x254] ss:$24 sps:$4 sm:$0xff]  }
  0x9c   : > { %945 = vmatprep.subr.bf16.mxu0 %v2849_v51  ;;  %v2906_v51 = vld [vmem:[#allocation6 + $0x250] ss:$24 sps:$4 sm:$0xff]  }
  0x9e   : > { %987 = vmatpush1.bf16.msra.mxu1 %v2848_v52  ;;  %v2911_v52 = vld [vmem:[#allocation6 + $0x284] ss:$24 sps:$4 sm:$0xff]  }
  0x9f   : > { %988 = vmatprep.subr.bf16.mxu1 %v2851_v53  ;;  %946 = vmatpush1.bf16.msra.mxu0 %v2853_v54  ;;  %v2909_v53 = vld [vmem:[#allocation6 + $0x280] ss:$24 sps:$4 sm:$0xff]   ;;  %v2914_v54 = vld [vmem:[#allocation6 + $0x2b4] ss:$24 sps:$4 sm:$0xff]  }
  0xa0   : > { %947 = vmatprep.subr.bf16.mxu0 %v2855_v55  ;;  %v2912_v55 = vld [vmem:[#allocation6 + $0x2b0] ss:$24 sps:$4 sm:$0xff]  }
  0xa2   : > { %989 = vmatpush1.bf16.msra.mxu1 %v2854_v56  ;;  %v2917_v56 = vld [vmem:[#allocation6 + $0x2e4] ss:$24 sps:$4 sm:$0xff]  }
  0xa3   : > { %990 = vmatprep.subr.bf16.mxu1 %v2857_v57  ;;  %948 = vmatpush1.bf16.msra.mxu0 %v2859_v58  ;;  %v2915_v57 = vld [vmem:[#allocation6 + $0x2e0] ss:$24 sps:$4 sm:$0xff]  }
  0xa4   : > { %949 = vmatprep.subr.bf16.mxu0 %v2861_v59 }
  0xa6   : > { %991 = vmatpush1.bf16.msra.mxu1 %v2860_v60 }
  0xa7   : > { %992 = vmatprep.subr.bf16.mxu1 %v2863_v61  ;;  %950 = vmatpush1.bf16.msra.mxu0 %v2865_v62 }
  0xa8   : > { %951 = vmatprep.subr.bf16.mxu0 %v2867_v63 }
  0xaa   : > { %993 = vmatpush1.bf16.msra.mxu1 %v2866_v0 }
  0xab   : > { %952 = vmatpush1.bf16.msra.mxu0 %v2869_v2  ;;  %2595 = vmatprep.subr.bf16.mxu1 %v3195_v4 }
  0xac   : > { %1003 = vmatprep.subr.bf16.mxu0 %v2872_v27 }
  0xad   : > { %995 = vmatmul.mubr.bf16.vlgmr.msra.gmra.mrb[0].mxu1 %v3426_v3 }
  0xae   : > { %954 = vmatmul.mubr.bf16.vlgmr.msra.gmra.mrb[0].mxu0 %v3426_v3  ;;  %2597 = vmatprep.mubr.msk.bf16.mxu1 %vm3196_vm0, %v3195_v4 }
  0xaf   : > { %1035 = vmatprep.mubr.bf16.mxu0 %v312_v48  ;;  %1004 = vmatpush1.bf16.msra.mxu0 %v2870_v26  ;;  %v2905_v48 = vld [vmem:[#allocation6 + $0x224] ss:$24 sps:$4 sm:$0xff]  }
  0xb0   : > { %1005 = vmatprep.subr.bf16.mxu0 %v2875_v28 }
  0xb3   : > { %1006 = vmatpush1.bf16.msra.mxu0 %v2873_v29 }
  0xb4   : > { %1007 = vmatprep.subr.bf16.mxu0 %v2878_v30 }
  0xb7   : > { %1008 = vmatpush1.bf16.msra.mxu0 %v2876_v31 }
  0xb8   : > { %1009 = vmatprep.subr.bf16.mxu0 %v2881_v32 }
  0xbb   : > { %1010 = vmatpush1.bf16.msra.mxu0 %v2879_v33 }
  0xbc   : > { %1011 = vmatprep.subr.bf16.mxu0 %v2884_v34 }
  0xbf   : > { %1012 = vmatpush1.bf16.msra.mxu0 %v2882_v35 }
  0xc0   : > { %1013 = vmatprep.subr.bf16.mxu0 %v2887_v36 }
  0xc3   : > { %1014 = vmatpush1.bf16.msra.mxu0 %v2885_v37 }
  0xc4   : > { %1015 = vmatprep.subr.bf16.mxu0 %v2890_v38 }
  0xc7   : > { %1016 = vmatpush1.bf16.msra.mxu0 %v2888_v39 }
  0xc8   : > { %1017 = vmatprep.subr.bf16.mxu0 %v2893_v40 }
  0xcb   : > { %1018 = vmatpush1.bf16.msra.mxu0 %v2891_v41 }
  0xcc   : > { %1019 = vmatprep.subr.bf16.mxu0 %v2896_v42 }
  0xcf   : > { %1020 = vmatpush1.bf16.msra.mxu0 %v2894_v43 }
  0xd0   : > { %1021 = vmatprep.subr.bf16.mxu0 %v2899_v44 }
  0xd3   : > { %1022 = vmatpush1.bf16.msra.mxu0 %v2897_v45 }
  0xd4   : > { %1023 = vmatprep.subr.bf16.mxu0 %v2902_v46 }
  0xd7   : > { %1024 = vmatpush1.bf16.msra.mxu0 %v2900_v47 }
  0xd8   : > { %1025 = vmatprep.subr.bf16.mxu0 %v2905_v48 }
  0xdb   : > { %1026 = vmatpush1.bf16.msra.mxu0 %v2903_v49 }
  0xdc   : > { %1027 = vmatprep.subr.bf16.mxu0 %v2908_v50 }
  0xdf   : > { %1028 = vmatpush1.bf16.msra.mxu0 %v2906_v51 }
  0xe0   : > { %1029 = vmatprep.subr.bf16.mxu0 %v2911_v52 }
  0xe3   : > { %1030 = vmatpush1.bf16.msra.mxu0 %v2909_v53 }
  0xe4   : > { %1031 = vmatprep.subr.bf16.mxu0 %v2914_v54 }
  0xe7   : > { %1032 = vmatpush1.bf16.msra.mxu0 %v2912_v55 }
  0xe8   : > { %1033 = vmatprep.subr.bf16.mxu0 %v2917_v56 }
  0xeb   : > { %1034 = vmatpush1.bf16.msra.mxu0 %v2915_v57 }
  0xee   : > { %1036 = vmatmul.mubr.bf16.vlgmr.msra.gmra.mrb[4].mxu0 %v3426_v3 }
 0x180   : > { %v996_v12 = vpop.f32.mrb[0].mxu1 }
 0x181   : > { %v997_v13 = vadd.f32 %v996_v12, %v422_v10  ;;  %v3446_v14 = vpop.f32.mrb[1].mxu1  ;;  %v955_v16 = vpop.f32.mrb[0].mxu0  ;;  %v429_v12 = vsub.s32 4, %v3433_v6 }
 0x182   : > { %v1000_v15 = vpop.f32.mrb[2].mxu1  ;;  %v956_v19 = vadd.f32 %v955_v16, %v414_v11  ;;  %v3450_v20 = vpop.f32.mrb[1].mxu0 }
 0x183   : > { %v3448_v17 = vpack.c.bf16 %v997_v13, %v997_v13  ;;  %v1001_v18 = vpop.f32.mrb[3].mxu1  ;;  %v959_v21 = vpop.f32.mrb[2].mxu0  ;;  %v430_v13 = vrot.slane %v3439_v8, %v429_v12 }
 0x184   : > { %v1044_v22 = vmul.f32 0.17677669, %v956_v19  ;;  %v960_v24 = vpop.f32.mrb[3].mxu0 }
 0x185   : > { %1165 = vrot.lane.b32.xlu1 %v3448_v17, %s3197_s16  ;;  %v1057_v23 = vsel %vm1052_vm1, %v3448_v17, 0 }
 0x186   : > { %2596 = vmatpush3.bf16.xpose.msra.mxu1 %v1057_v23  ;;  %v3456_v25 = vpack.c.bf16 %v1044_v22, %v1044_v22 }
 0x187   : > { %2601 = vmatprep.subr.bf16.mxu1 %v3195_v4 }
 0x189   : > { %1162 = vrot.lane.b32.xlu1 %v3456_v25, %s3197_s16 }
 0x18d   : > { %2598 = vmatmul.mubr.msk.bf16.vlgmr.msra.gmra.mrb[4].mxu1 %vm1052_vm1, %v3456_v25 }
 0x18e   : > { %2603 = vmatprep.mubr.msk.bf16.mxu1 %vm3196_vm0, %v3195_v4 }
 0x1c1   : > { %v1037_v2 = vpop.f32.mrb[4].mxu0 }
 0x1c2   : > { %v3467_v5 = vpop.f32.mrb[5].mxu0  ;;  %v1038_v15 = vadd.f32 %v1037_v2, %v430_v13 }
 0x1c3   : > { %v1041_v7 = vpop.f32.mrb[6].mxu0 }
 0x1c4   : > { %v1042_v10 = vpop.f32.mrb[7].mxu0  ;;  %v3472_v16 = vpack.c.bf16 %v1038_v15, %v1038_v15 }
 0x1c6   : > { %v1118_v18 = vsel %vm1116_vm3, %v3472_v16, 0 }
 0x1c7   : > { %2602 = vmatpush3.bf16.msra.mxu1 %v1118_v18 }
 0x1c8   : > { %2607 = vmatprep.subr.bf16.mxu1 %v3195_v4 }
 0x1f7   : > { %v1166_v23 = vpop.permute.xlu1 %1165 }
 0x1f8   : > { %v1171_v26 = vsel %vm1052_vm1, %v1166_v23, 0 }
 0x1fb   : > { %v1163_v27 = vpop.permute.xlu1 %1162 }
 0x260   : > { %v1093_v58 = vpop.f32.mrb[4].mxu1 }
 0x261   : > { %v2599_v59 = vpop.f32.mrb[5].mxu1  ;;  %v1100_v60 = vsel %vm1099_vm2, %v1093_v58, -inf }
 0x262   : > { %1101 = vmax.xlane.f32.xlu0 %v1100_v60  ;;  %v1096_v61 = vpop.f32.mrb[6].mxu1 }
 0x263   : > { %v2600_v62 = vpop.f32.mrb[7].mxu1 }
 0x2ef   : > { %v1102_v63 = vpop.xlane.xlu0 %1101 }
 0x2f0   : > { %v1103_v0 = vsub.f32 %v1093_v58, %v1102_v63 }
 0x2f2   : > { %v1104_v1 = vmul.f32 1.442695, %v1103_v0 }
 0x2f4   : > { %2966 = vpow2.f32 %v1104_v1 }
 0x2fe   : > { %v2967_v11 = vpop.eup %2966 }
 0x2ff   : > { %v1106_v3 = vsel %vm1099_vm2, %v2967_v11, 0.0 }
 0x300   : > { %1107 = vadd.xlane.f32.xlu0 %v1106_v3 }
 0x38d   : > { %v1108_v19 = vpop.xlane.xlu0 %1107 }
 0x38e   : > { %2968 = vrcp.f32 %v1108_v19 }
 0x398   : > { %v2969_v21 = vpop.eup %2968 }
 0x399   : > { %v1110_v22 = vmul.f32 %v2969_v21, %v2967_v11 }
 0x39b   : > { %1111 = vst.msk [vmem:[%s3478_s18] sm:$0xff] %vm1099_vm2, %v1110_v22  ;;  %v1112_v24 = vpack.c.bf16 %v1110_v22, %v1110_v22 }
 0x39d   : > { %2604 = vmatmul.mubr.msk.bf16.vlgmr.msra.gmra.mrb[8].mxu1 %vm1099_vm2, %v1112_v24 }
 0x39e   : > { %2608 = vmatpush3.bf16.xpose.msra.mxu1 %v1171_v26  ;;  %2609 = vmatprep.mubr.msk.bf16.mxu1 %vm3196_vm0, %v3195_v4 }
 0x39f   : > { %2613 = vmatprep.subr.bf16.mxu1 %v3195_v4 }
 0x3a5   : > { %2610 = vmatmul.mubr.msk.bf16.vlgmr.msra.gmra.mrb[12].mxu1 %vm1052_vm1, %v1163_v27 }
 0x3a6   : > { %2615 = vmatprep.mubr.msk.bf16.mxu1 %vm3196_vm0, %v3195_v4 }
 0x470   : > { %v1154_v28 = vpop.f32.mrb[8].mxu1 }
 0x471   : > { %1160 = vst.msk [vmem:[#allocation2] sm:$0xff] %vm1052_vm1, %v1154_v28  ;;  %v2605_v29 = vpop.f32.mrb[9].mxu1 }
 0x472   : > { %v1157_v30 = vpop.f32.mrb[10].mxu1 }
 0x473   : > { %v2606_v31 = vpop.f32.mrb[11].mxu1 }
 0x478   : > { %v1207_v32 = vpop.f32.mrb[12].mxu1 }
 0x479   : > { %v2611_v33 = vpop.f32.mrb[13].mxu1  ;;  %v1213_v34 = vsel %vm1099_vm2, %v1207_v32, -inf }
 0x47a   : > { %1214 = vmax.xlane.f32.xlu0 %v1213_v34  ;;  %v1210_v35 = vpop.f32.mrb[14].mxu1  ;;  %v425_v34 = vsub.s32 3, %v3433_v6 }
 0x47b   : > { %v2612_v36 = vpop.f32.mrb[15].mxu1 }
 0x47c   : > { %v417_v36 = vsub.s32 1, %v3433_v6 }
 0x490   : > { %1228 = vrot.lane.b32.xlu0 %v3472_v16, %s3197_s16 }
 0x494   : > { %1284 = vrot.lane.b32.xlu0 %v3448_v17, %s3198_s19 }
 0x498   : > { %1282 = vrot.lane.b32.xlu0 %v3456_v25, %s3198_s19 }
 0x507   : > { %v1215_v37 = vpop.xlane.xlu0 %1214 }
 0x508   : > { %v1216_v38 = vsub.f32 %v1207_v32, %v1215_v37 }
 0x50a   : > { %v1217_v39 = vmul.f32 1.442695, %v1216_v38  ;;  %v433_v38 = vsub.s32 5, %v3433_v6 }
 0x50b   : > { %v1229_v40 = vpop.permute.xlu0 %1228 }
 0x50c   : > { %2970 = vpow2.f32 %v1217_v39  ;;  %v1234_v41 = vsel %vm1116_vm3, %v1229_v40, 0  ;;  %v418_v39 = vrot.slane %v3439_v8, %v417_v36 }
 0x50d   : > { %2614 = vmatpush3.bf16.msra.mxu1 %v1234_v41 }
 0x50e   : > { %2619 = vmatprep.subr.bf16.mxu1 %v3195_v4 }
 0x50f   : > { %v1285_v47 = vpop.permute.xlu0 %1284 }
 0x510   : > { %v1290_v49 = vsel %vm1052_vm1, %v1285_v47, 0 }
 0x513   : > { %v1283_v51 = vpop.permute.xlu0 %1282 }
 0x516   : > { %v2971_v42 = vpop.eup %2970 }
 0x517   : > { %v1219_v43 = vsel %vm1099_vm2, %v2971_v42, 0.0 }
 0x518   : > { %1220 = vadd.xlane.f32.xlu1 %v1219_v43 }
 0x529   : > { %1346 = vrot.lane.b32.xlu1 %v3472_v16, %s3198_s19 }
 0x5a5   : > { %v1221_v44 = vpop.xlane.xlu1 %1220 }
 0x5a6   : > { %2972 = vrcp.f32 %v1221_v44  ;;  %v958_v44 = vadd.f32 %v3450_v20, %v418_v39 }
 0x5a8   : > { %v1045_v47 = vmul.f32 0.17677669, %v958_v44 }
 0x5a9   : > { %v1347_v50 = vpop.permute.xlu1 %1346 }
 0x5aa   : > { %v1352_v52 = vsel %vm1116_vm3, %v1347_v50, 0  ;;  %v3564_v20 = vpack.c.bf16 %v1045_v47, %v1045_v47 }
 0x5b0   : > { %v2973_v45 = vpop.eup %2972 }
 0x5b1   : > { %v1223_v46 = vmul.f32 %v2973_v45, %v2971_v42  ;;  %v434_v42 = vrot.slane %v3439_v8, %v433_v38 }
 0x5b3   : > { %2500 = vst.msk [vmem:[%s3478_s18 + $0x8] sm:$0xff] %vm1099_vm2, %v1223_v46  ;;  %v1226_v48 = vpack.c.bf16 %v1223_v46, %v1223_v46  ;;  %v1040_v46 = vadd.f32 %v3467_v5, %v434_v42 }
 0x5b5   : > { %2616 = vmatmul.mubr.msk.bf16.vlgmr.msra.gmra.mrb[16].mxu1 %vm1099_vm2, %v1226_v48 }
 0x5b6   : > { %2620 = vmatpush3.bf16.xpose.msra.mxu1 %v1290_v49  ;;  %2621 = vmatprep.mubr.msk.bf16.mxu1 %vm3196_vm0, %v3195_v4 }
 0x5b7   : > { %2625 = vmatprep.subr.bf16.mxu1 %v3195_v4 }
 0x5bd   : > { %2622 = vmatmul.mubr.msk.bf16.vlgmr.msra.gmra.mrb[20].mxu1 %vm1052_vm1, %v1283_v51 }
 0x5be   : > { %2626 = vmatpush3.bf16.msra.mxu1 %v1352_v52  ;;  %2627 = vmatprep.mubr.msk.bf16.mxu1 %vm3196_vm0, %v3195_v4 }
 0x5bf   : > { %2631 = vmatprep.subr.bf16.mxu1 %v3195_v4 }
 0x688   : > { %v3515_v53 = vpop.f32.mrb[16].mxu1 }
 0x689   : > { %v2617_v54 = vpop.f32.mrb[17].mxu1 }
 0x68a   : > { %v1273_v55 = vpop.f32.mrb[18].mxu1 }
 0x68b   : > { %v2618_v56 = vpop.f32.mrb[19].mxu1 }
 0x690   : > { %v1326_v57 = vpop.f32.mrb[20].mxu1 }
 0x691   : > { %v2623_v58 = vpop.f32.mrb[21].mxu1  ;;  %v1332_v59 = vsel %vm1099_vm2, %v1326_v57, -inf }
 0x692   : > { %1333 = vmax.xlane.f32.xlu0 %v1332_v59  ;;  %v1329_v60 = vpop.f32.mrb[22].mxu1 }
 0x693   : > { %v2624_v61 = vpop.f32.mrb[23].mxu1 }
 0x71f   : > { %v1334_v62 = vpop.xlane.xlu0 %1333 }
 0x720   : > { %v1335_v63 = vsub.f32 %v1326_v57, %v1334_v62 }
 0x722   : > { %v1336_v0 = vmul.f32 1.442695, %v1335_v63 }
 0x724   : > { %2974 = vpow2.f32 %v1336_v0 }
 0x72e   : > { %v2975_v1 = vpop.eup %2974 }
 0x72f   : > { %v1338_v2 = vsel %vm1099_vm2, %v2975_v1, 0.0 }
 0x730   : > { %1339 = vadd.xlane.f32.xlu1 %v1338_v2 }
 0x741   : > { %1402 = vrot.lane.b32.xlu1 %v3448_v17, %s3199_s14 }
 0x745   : > { %1400 = vrot.lane.b32.xlu1 %v3456_v25, %s3199_s14 }
 0x7bd   : > { %v1340_v7 = vpop.xlane.xlu1 %1339 }
 0x7be   : > { %2976 = vrcp.f32 %v1340_v7 }
 0x7c1   : > { %v1403_v3 = vpop.permute.xlu1 %1402 }
 0x7c2   : > { %v1408_v13 = vsel %vm1052_vm1, %v1403_v3, 0 }
 0x7c5   : > { %v1401_v17 = vpop.permute.xlu1 %1400 }
 0x7c8   : > { %v2977_v10 = vpop.eup %2976 }
 0x7c9   : > { %v1342_v11 = vmul.f32 %v2977_v10, %v2975_v1 }
 0x7cb   : > { %2503 = vst.msk [vmem:[%s3478_s18 + $0x10] sm:$0xff] %vm1099_vm2, %v1342_v11  ;;  %v1345_v12 = vpack.c.bf16 %v1342_v11, %v1342_v11 }
 0x7cd   : > { %2628 = vmatmul.mubr.msk.bf16.vlgmr.msra.gmra.mrb[24].mxu1 %vm1099_vm2, %v1345_v12 }
 0x7ce   : > { %2632 = vmatpush3.bf16.xpose.msra.mxu1 %v1408_v13  ;;  %2633 = vmatprep.mubr.msk.bf16.mxu1 %vm3196_vm0, %v3195_v4 }
 0x7cf   : > { %2637 = vmatprep.subr.bf16.mxu1 %v3195_v4 }
 0x7d5   : > { %2634 = vmatmul.mubr.msk.bf16.vlgmr.msra.gmra.mrb[28].mxu1 %vm1052_vm1, %v1401_v17 }
 0x7d6   : > { %2639 = vmatprep.mubr.msk.bf16.mxu1 %vm3196_vm0, %v3195_v4 }
 0x8a0   : > { %v3533_v25 = vpop.f32.mrb[24].mxu1 }
 0x8a1   : > { %v2629_v15 = vpop.f32.mrb[25].mxu1 }
 0x8a2   : > { %v1391_v18 = vpop.f32.mrb[26].mxu1 }
 0x8a3   : > { %v2630_v19 = vpop.f32.mrb[27].mxu1 }
 0x8a8   : > { %v1444_v21 = vpop.f32.mrb[28].mxu1 }
 0x8a9   : > { %v2635_v22 = vpop.f32.mrb[29].mxu1  ;;  %v1450_v23 = vsel %vm1099_vm2, %v1444_v21, -inf }
 0x8aa   : > { %1451 = vmax.xlane.f32.xlu0 %v1450_v23  ;;  %v1447_v24 = vpop.f32.mrb[30].mxu1 }
 0x8ab   : > { %v2636_v26 = vpop.f32.mrb[31].mxu1 }
 0x8c0   : > { %1464 = vrot.lane.b32.xlu0 %v3472_v16, %s3199_s14  ;;  %v426_v16 = vrot.slane %v3439_v8, %v425_v34  ;;  %v3562_v8 = vpack.c.bf16 %v1040_v46, %v1040_v46 }
 0x8c2   : > { %v999_v37 = vadd.f32 %v3446_v14, %v426_v16  ;;  %v1582_v5 = vsel %vm1116_vm3, %v3562_v8, 0 }
 0x8c4   : > { %v3549_v41 = vpack.c.bf16 %v999_v37, %v999_v37 }
 0x8c6   : > { %v1522_v14 = vsel %vm1052_vm1, %v3549_v41, 0 }
 0x937   : > { %v1452_v27 = vpop.xlane.xlu0 %1451 }
 0x938   : > { %v1453_v28 = vsub.f32 %v1444_v21, %v1452_v27 }
 0x93a   : > { %v1454_v29 = vmul.f32 1.442695, %v1453_v28 }
 0x93b   : > { %v1465_v30 = vpop.permute.xlu0 %1464 }
 0x93c   : > { %2978 = vpow2.f32 %v1454_v29  ;;  %v1470_v31 = vsel %vm1116_vm3, %v1465_v30, 0 }
 0x93d   : > { %2638 = vmatpush3.bf16.msra.mxu1 %v1470_v31 }
 0x93e   : > { %2643 = vmatprep.subr.bf16.mxu1 %v3195_v4 }
 0x946   : > { %v2979_v32 = vpop.eup %2978 }
 0x947   : > { %v1456_v33 = vsel %vm1099_vm2, %v2979_v32, 0.0 }
 0x948   : > { %1457 = vadd.xlane.f32.xlu1 %v1456_v33 }
 0x9d5   : > { %v1458_v35 = vpop.xlane.xlu1 %1457 }
 0x9d6   : > { %2980 = vrcp.f32 %v1458_v35 }
 0x9e0   : > { %v2981_v40 = vpop.eup %2980 }
 0x9e1   : > { %v1460_v43 = vmul.f32 %v2981_v40, %v2979_v32 }
 0x9e3   : > { %2506 = vst.msk [vmem:[%s3478_s18 + $0x18] sm:$0xff] %vm1099_vm2, %v1460_v43  ;;  %v1463_v45 = vpack.c.bf16 %v1460_v43, %v1460_v43 }
 0x9e5   : > { %2640 = vmatmul.mubr.msk.bf16.vlgmr.msra.gmra.mrb[32].mxu1 %vm1099_vm2, %v1463_v45 }
 0x9e6   : > { %2644 = vmatpush3.bf16.xpose.msra.mxu1 %v1522_v14  ;;  %2645 = vmatprep.mubr.msk.bf16.mxu1 %vm3196_vm0, %v3195_v4 }
 0x9e7   : > { %2649 = vmatprep.subr.bf16.mxu1 %v3195_v4 }
 0x9ed   : > { %2646 = vmatmul.mubr.msk.bf16.vlgmr.msra.gmra.mrb[36].mxu1 %vm1052_vm1, %v3564_v20 }
 0x9ee   : > { %2650 = vmatpush3.bf16.msra.mxu1 %v1582_v5  ;;  %2651 = vmatprep.mubr.msk.bf16.mxu1 %vm3196_vm0, %v3195_v4 }
 0x9ef   : > { %2655 = vmatprep.subr.bf16.mxu1 %v3195_v4 }
 0xab8   : > { %v3573_v48 = vpop.f32.mrb[32].mxu1 }
 0xab9   : > { %v2641_v49 = vpop.f32.mrb[33].mxu1 }
 0xaba   : > { %v1509_v50 = vpop.f32.mrb[34].mxu1 }
 0xabb   : > { %v2642_v51 = vpop.f32.mrb[35].mxu1 }
 0xac0   : > { %v1558_v52 = vpop.f32.mrb[36].mxu1 }
 0xac1   : > { %v2647_v54 = vpop.f32.mrb[37].mxu1  ;;  %v1564_v55 = vsel %vm1099_vm2, %v1558_v52, -inf }
 0xac2   : > { %1565 = vmax.xlane.f32.xlu0 %v1564_v55  ;;  %v1561_v56 = vpop.f32.mrb[38].mxu1 }
 0xac3   : > { %v2648_v57 = vpop.f32.mrb[39].mxu1 }
 0xad8   : > { %1626 = vrot.lane.b32.xlu0 %v3564_v20, %s3197_s16 }
 0xb4f   : > { %v1566_v58 = vpop.xlane.xlu0 %1565 }
 0xb50   : > { %v1567_v59 = vsub.f32 %v1558_v52, %v1566_v58 }
 0xb52   : > { %v1568_v60 = vmul.f32 1.442695, %v1567_v59 }
 0xb53   : > { %v1627_v11 = vpop.permute.xlu0 %1626 }
 0xb54   : > { %2982 = vpow2.f32 %v1568_v60 }
 0xb5e   : > { %v2983_v61 = vpop.eup %2982 }
 0xb5f   : > { %v1570_v62 = vsel %vm1099_vm2, %v2983_v61, 0.0 }
 0xb60   : > { %1571 = vadd.xlane.f32.xlu1 %v1570_v62 }
 0xb71   : > { %1629 = vrot.lane.b32.xlu1 %v3549_v41, %s3197_s16 }
 0xbed   : > { %v1572_v63 = vpop.xlane.xlu1 %1571 }
 0xbee   : > { %2984 = vrcp.f32 %v1572_v63 }
 0xbf1   : > { %v1630_v2 = vpop.permute.xlu1 %1629 }
 0xbf2   : > { %v1635_v10 = vsel %vm1052_vm1, %v1630_v2, 0 }
 0xbf8   : > { %v2985_v0 = vpop.eup %2984 }
 0xbf9   : > { %v1574_v1 = vmul.f32 %v2985_v0, %v2983_v61 }
 0xbfb   : > { %2509 = vst.msk [vmem:[%s3478_s18 + $0x20] sm:$0xff] %vm1099_vm2, %v1574_v1  ;;  %v1577_v7 = vpack.c.bf16 %v1574_v1, %v1574_v1 }
 0xbfd   : > { %2652 = vmatmul.mubr.msk.bf16.vlgmr.msra.gmra.mrb[40].mxu1 %vm1099_vm2, %v1577_v7 }
 0xbfe   : > { %2656 = vmatpush3.bf16.xpose.msra.mxu1 %v1635_v10  ;;  %2657 = vmatprep.mubr.msk.bf16.mxu1 %vm3196_vm0, %v3195_v4 }
 0xbff   : > { %2661 = vmatprep.subr.bf16.mxu1 %v3195_v4 }
 0xc05   : > { %2658 = vmatmul.mubr.msk.bf16.vlgmr.msra.gmra.mrb[44].mxu1 %vm1052_vm1, %v1627_v11 }
 0xc06   : > { %2663 = vmatprep.mubr.msk.bf16.mxu1 %vm3196_vm0, %v3195_v4 }
 0xcd0   : > { %v1618_v3 = vpop.f32.mrb[40].mxu1 }
 0xcd1   : > { %1624 = vst.msk [vmem:[#allocation2 + $0x8] sm:$0xff] %vm1052_vm1, %v1618_v3  ;;  %v2653_v12 = vpop.f32.mrb[41].mxu1 }
 0xcd2   : > { %v1621_v13 = vpop.f32.mrb[42].mxu1 }
 0xcd3   : > { %v2654_v17 = vpop.f32.mrb[43].mxu1 }
 0xcd8   : > { %v1671_v15 = vpop.f32.mrb[44].mxu1 }
 0xcd9   : > { %v2659_v18 = vpop.f32.mrb[45].mxu1  ;;  %v1677_v19 = vsel %vm1099_vm2, %v1671_v15, -inf }
 0xcda   : > { %1678 = vmax.xlane.f32.xlu1 %v1677_v19  ;;  %v1674_v21 = vpop.f32.mrb[46].mxu1 }
 0xcdb   : > { %v2660_v22 = vpop.f32.mrb[47].mxu1 }
 0xceb   : > { %1692 = vrot.lane.b32.xlu1 %v3562_v8, %s3197_s16 }
 0xcef   : > { %1745 = vrot.lane.b32.xlu1 %v3564_v20, %s3198_s19 }
 0xd67   : > { %v1679_v23 = vpop.xlane.xlu1 %1678 }
 0xd68   : > { %v1680_v24 = vsub.f32 %v1671_v15, %v1679_v23 }
 0xd6a   : > { %v1681_v26 = vmul.f32 1.442695, %v1680_v24 }
 0xd6b   : > { %v1693_v27 = vpop.permute.xlu1 %1692 }
 0xd6c   : > { %2986 = vpow2.f32 %v1681_v26  ;;  %v1698_v28 = vsel %vm1116_vm3, %v1693_v27, 0  ;;  %v2918_v26 = vld [vmem:[#allocation8] ss:$8 sps:$4 sm:$0xff]   ;;  %v2920_v27 = vld [vmem:[#allocation8 + $0x4] ss:$8 sps:$4 sm:$0xff]  }
 0xd6d   : > { %2662 = vmatpush3.bf16.msra.mxu1 %v1698_v28  ;;  %v2923_v28 = vld [vmem:[#allocation8 + $0x14] ss:$8 sps:$4 sm:$0xff]   ;;  %2187 = vmatprep.subr.bf16.mxu0 %v2920_v27 }
 0xd6e   : > { %2667 = vmatprep.subr.bf16.mxu1 %v3195_v4  ;;  %2188 = vmatpush1.bf16.msra.mxu0 %v2918_v26 }
 0xd6f   : > { %v1746_v37 = vpop.permute.xlu1 %1745  ;;  %2189 = vmatprep.subr.bf16.mxu0 %v2923_v28 }
 0xd76   : > { %v2987_v29 = vpop.eup %2986 }
 0xd77   : > { %v1683_v30 = vsel %vm1099_vm2, %v2987_v29, 0.0 }
 0xd78   : > { %1684 = vadd.xlane.f32.xlu0 %v1683_v30  ;;  %v2924_v30 = vld [vmem:[#allocation8 + $0x20] ss:$8 sps:$4 sm:$0xff]  }
 0xd8e   : > { %1747 = vrot.lane.b32.xlu0 %v3549_v41, %s3198_s19 }
 0xe05   : > { %v1685_v31 = vpop.xlane.xlu0 %1684 }
 0xe06   : > { %2988 = vrcp.f32 %v1685_v31  ;;  %v2929_v31 = vld [vmem:[#allocation8 + $0x34] ss:$8 sps:$4 sm:$0xff]  }
 0xe09   : > { %v1748_v34 = vpop.permute.xlu0 %1747 }
 0xe0a   : > { %v1753_v16 = vsel %vm1052_vm1, %v1748_v34, 0  ;;  %v2930_v34 = vld [vmem:[#allocation8 + $0x40] ss:$8 sps:$4 sm:$0xff]  }
 0xe10   : > { %v2989_v32 = vpop.eup %2988 }
 0xe11   : > { %v1687_v33 = vmul.f32 %v2989_v32, %v2987_v29  ;;  %v2926_v29 = vld [vmem:[#allocation8 + $0x24] ss:$8 sps:$4 sm:$0xff]   ;;  %v2927_v32 = vld [vmem:[#allocation8 + $0x30] ss:$8 sps:$4 sm:$0xff]  }
 0xe13   : > { %2512 = vst.msk [vmem:[%s3478_s18 + $0x28] sm:$0xff] %vm1099_vm2, %v1687_v33  ;;  %v1690_v35 = vpack.c.bf16 %v1687_v33, %v1687_v33  ;;  %v2932_v33 = vld [vmem:[#allocation8 + $0x44] ss:$8 sps:$4 sm:$0xff]  }
 0xe15   : > { %2664 = vmatmul.mubr.msk.bf16.vlgmr.msra.gmra.mrb[48].mxu1 %vm1099_vm2, %v1690_v35  ;;  %v2935_v35 = vld [vmem:[#allocation8 + $0x54] ss:$8 sps:$4 sm:$0xff]  }
 0xe16   : > { %2668 = vmatpush3.bf16.xpose.msra.mxu1 %v1753_v16  ;;  %2669 = vmatprep.mubr.msk.bf16.mxu1 %vm3196_vm0, %v3195_v4  ;;  %v2933_v16 = vld [vmem:[#allocation8 + $0x50] ss:$8 sps:$4 sm:$0xff]  }
 0xe17   : > { %2673 = vmatprep.subr.bf16.mxu1 %v3195_v4 }
 0xe1d   : > { %2670 = vmatmul.mubr.msk.bf16.vlgmr.msra.gmra.mrb[52].mxu1 %vm1052_vm1, %v1746_v37  ;;  %v2938_v37 = vld [vmem:[#allocation8 + $0x64] ss:$8 sps:$4 sm:$0xff]  }
 0xe1e   : > { %2675 = vmatprep.mubr.msk.bf16.mxu1 %vm3196_vm0, %v3195_v4 }
 0xee8   : > { %v3612_v38 = vpop.f32.mrb[48].mxu1 }
 0xee9   : > { %v2665_v39 = vpop.f32.mrb[49].mxu1 }
 0xeea   : > { %v1737_v40 = vpop.f32.mrb[50].mxu1  ;;  %v2941_v39 = vld [vmem:[#allocation8 + $0x74] ss:$8 sps:$4 sm:$0xff]  }
 0xeeb   : > { %v2666_v42 = vpop.f32.mrb[51].mxu1  ;;  %v2939_v40 = vld [vmem:[#allocation8 + $0x70] ss:$8 sps:$4 sm:$0xff]  }
 0xeec   : > { %v2944_v42 = vld [vmem:[#allocation8 + $0x84] ss:$8 sps:$4 sm:$0xff]  }
 0xef0   : > { %v1789_v43 = vpop.f32.mrb[52].mxu1 }
 0xef1   : > { %v2671_v44 = vpop.f32.mrb[53].mxu1  ;;  %v1795_v45 = vsel %vm1099_vm2, %v1789_v43, -inf }
 0xef2   : > { %1796 = vmax.xlane.f32.xlu1 %v1795_v45  ;;  %v1792_v46 = vpop.f32.mrb[54].mxu1  ;;  %v2947_v44 = vld [vmem:[#allocation8 + $0x94] ss:$8 sps:$4 sm:$0xff]   ;;  %v2945_v45 = vld [vmem:[#allocation8 + $0x90] ss:$8 sps:$4 sm:$0xff]  }
 0xef3   : > { %v2672_v14 = vpop.f32.mrb[55].mxu1  ;;  %v2950_v46 = vld [vmem:[#allocation8 + $0xa4] ss:$8 sps:$4 sm:$0xff]  }
 0xef4   : > { %v2948_v14 = vld [vmem:[#allocation8 + $0xa0] ss:$8 sps:$4 sm:$0xff]  }
 0xf03   : > { %1809 = vrot.lane.b32.xlu1 %v3562_v8, %s3198_s19 }
 0xf07   : > { %1862 = vrot.lane.b32.xlu1 %v3564_v20, %s3199_s14 }
 0xf7f   : > { %v1797_v47 = vpop.xlane.xlu1 %1796 }
 0xf80   : > { %v1798_v5 = vsub.f32 %v1789_v43, %v1797_v47  ;;  %v2942_v43 = vld [vmem:[#allocation8 + $0x80] ss:$8 sps:$4 sm:$0xff]   ;;  %v2953_v47 = vld [vmem:[#allocation8 + $0xb4] ss:$8 sps:$4 sm:$0xff]  }
 0xf82   : > { %v1799_v49 = vmul.f32 1.442695, %v1798_v5  ;;  %v2951_v5 = vld [vmem:[#allocation8 + $0xb0] ss:$8 sps:$4 sm:$0xff]  }
 0xf83   : > { %v1810_v50 = vpop.permute.xlu1 %1809 }
 0xf84   : > { %2990 = vpow2.f32 %v1799_v49  ;;  %v1815_v51 = vsel %vm1116_vm3, %v1810_v50, 0  ;;  %v2956_v49 = vld [vmem:[#allocation8 + $0xc4] ss:$8 sps:$4 sm:$0xff]   ;;  %v2954_v50 = vld [vmem:[#allocation8 + $0xc0] ss:$8 sps:$4 sm:$0xff]  }
 0xf85   : > { %2674 = vmatpush3.bf16.msra.mxu1 %v1815_v51  ;;  %v2959_v51 = vld [vmem:[#allocation8 + $0xd4] ss:$8 sps:$4 sm:$0xff]  }
 0xf86   : > { %2679 = vmatprep.subr.bf16.mxu1 %v3195_v4 }
 0xf87   : > { %v1863_v60 = vpop.permute.xlu1 %1862 }
 0xf8e   : > { %v2991_v52 = vpop.eup %2990 }
 0xf8f   : > { %v1801_v54 = vsel %vm1099_vm2, %v2991_v52, 0.0 }
 0xf90   : > { %1802 = vadd.xlane.f32.xlu0 %v1801_v54  ;;  %v2960_v54 = vld [vmem:[#allocation8 + $0xe0] ss:$8 sps:$4 sm:$0xff]  }
 0xfa6   : > { %1864 = vrot.lane.b32.xlu0 %v3549_v41, %s3199_s14 }
0x101d   : > { %v1803_v55 = vpop.xlane.xlu0 %1802 }
0x101e   : > { %2992 = vrcp.f32 %v1803_v55  ;;  %v2962_v55 = vld [vmem:[#allocation8 + $0xe4] ss:$8 sps:$4 sm:$0xff]  }
0x1021   : > { %v1865_v57 = vpop.permute.xlu0 %1864 }
0x1022   : > { %v1870_v59 = vsel %vm1052_vm1, %v1865_v57, 0 }
0x1028   : > { %v2993_v20 = vpop.eup %2992 }
0x1029   : > { %v1805_v56 = vmul.f32 %v2993_v20, %v2991_v52  ;;  %v2957_v52 = vld [vmem:[#allocation8 + $0xd0] ss:$8 sps:$4 sm:$0xff]   ;;  %v2965_v20 = vld [vmem:[#allocation8 + $0xf4] ss:$8 sps:$4 sm:$0xff]  }
0x102b   : > { %2515 = vst.msk [vmem:[%s3478_s18 + $0x30] sm:$0xff] %vm1099_vm2, %v1805_v56  ;;  %v1808_v58 = vpack.c.bf16 %v1805_v56, %v1805_v56  ;;  %v2963_v56 = vld [vmem:[#allocation8 + $0xf0] ss:$8 sps:$4 sm:$0xff]  }
0x102d   : > { %2676 = vmatmul.mubr.msk.bf16.vlgmr.msra.gmra.mrb[56].mxu1 %vm1099_vm2, %v1808_v58 }
0x102e   : > { %2680 = vmatpush3.bf16.xpose.msra.mxu1 %v1870_v59  ;;  %2681 = vmatprep.mubr.msk.bf16.mxu1 %vm3196_vm0, %v3195_v4 }
0x102f   : > { %2685 = vmatprep.subr.bf16.mxu1 %v3195_v4 }
0x1035   : > { %2682 = vmatmul.mubr.msk.bf16.vlgmr.msra.gmra.mrb[60].mxu1 %vm1052_vm1, %v1863_v60 }
0x1036   : > { %2687 = vmatprep.mubr.msk.bf16.mxu1 %vm3196_vm0, %v3195_v4 }
0x1100   : > { %v1851_v41 = vpop.f32.mrb[56].mxu1 }
0x1101   : > { %v2677_v61 = vpop.f32.mrb[57].mxu1 }
0x1102   : > { %v1854_v62 = vpop.f32.mrb[58].mxu1 }
0x1103   : > { %v2678_v63 = vpop.f32.mrb[59].mxu1 }
0x1108   : > { %v1906_v0 = vpop.f32.mrb[60].mxu1 }
0x1109   : > { %v2683_v1 = vpop.f32.mrb[61].mxu1  ;;  %v1912_v2 = vsel %vm1099_vm2, %v1906_v0, -inf }
0x110a   : > { %1913 = vmax.xlane.f32.xlu1 %v1912_v2  ;;  %v1909_v7 = vpop.f32.mrb[62].mxu1 }
0x110b   : > { %v2684_v10 = vpop.f32.mrb[63].mxu1 }
0x111b   : > { %1926 = vrot.lane.b32.xlu1 %v3562_v8, %s3199_s14 }
0x111f   : > { %1277 = vrot.lane.b32.xlu1 %v3515_v53, %s3199_s14 }
0x1123   : > { %1858 = vrot.lane.b32.xlu1 %v1851_v41, %s3198_s19 }
0x1127   : > { %1395 = vrot.lane.b32.xlu1 %v3533_v25, %s3198_s19 }
0x1197   : > { %v1914_v4 = vpop.xlane.xlu1 %1913 }
0x1198   : > { %v1915_v11 = vsub.f32 %v1906_v0, %v1914_v4 }
0x119a   : > { %v1916_v3 = vmul.f32 1.442695, %v1915_v11 }
0x119b   : > { %v1927_v12 = vpop.permute.xlu1 %1926 }
0x119c   : > { %2994 = vpow2.f32 %v1916_v3  ;;  %v1932_v13 = vsel %vm1116_vm3, %v1927_v12, 0 }
0x119d   : > { %2686 = vmatpush3.bf16.msra.mxu1 %v1932_v13 }
0x119f   : > { %v1278_v17 = vpop.permute.xlu1 %1277 }
0x11a0   : > { %1281 = vst.msk [vmem:[#allocation2] sm:$0xff] %vm1280_vm4, %v1278_v17 }
0x11a3   : > { %v1859_v8 = vpop.permute.xlu1 %1858 }
0x11a6   : > { %v2995_v15 = vpop.eup %2994 }
0x11a7   : > { %v1396_v53 = vpop.permute.xlu1 %1395  ;;  %v1918_v18 = vsel %vm1099_vm2, %v2995_v15, 0.0 }
0x11a8   : > { %1399 = vst.msk [vmem:[#allocation2] sm:$0xff] %vm1398_vm5, %v1396_v53  ;;  %1919 = vadd.xlane.f32.xlu0 %v1918_v18 }
0x11be   : > { %1741 = vrot.lane.b32.xlu0 %v3612_v38, %s3199_s14  ;;  %v2936_v38 = vld [vmem:[#allocation8 + $0x60] ss:$8 sps:$4 sm:$0xff]  }
0x11c2   : > { %1513 = vrot.lane.b32.xlu0 %v3573_v48, %s3197_s16  ;;  %v2921_v48 = vld [vmem:[#allocation8 + $0x10] ss:$8 sps:$4 sm:$0xff]  }
0x11c3   : > { %2190 = vmatpush1.bf16.msra.mxu0 %v2921_v48 }
0x11c4   : > { %2191 = vmatprep.subr.bf16.mxu0 %v2926_v29 }
0x11c7   : > { %2192 = vmatpush1.bf16.msra.mxu0 %v2924_v30 }
0x11c8   : > { %2193 = vmatprep.subr.bf16.mxu0 %v2929_v31 }
0x11cb   : > { %2194 = vmatpush1.bf16.msra.mxu0 %v2927_v32 }
0x11cc   : > { %2195 = vmatprep.subr.bf16.mxu0 %v2932_v33 }
0x11cf   : > { %2196 = vmatpush1.bf16.msra.mxu0 %v2930_v34 }
0x11d0   : > { %2197 = vmatprep.subr.bf16.mxu0 %v2935_v35 }
0x11d3   : > { %2198 = vmatpush1.bf16.msra.mxu0 %v2933_v16 }
0x11d4   : > { %2199 = vmatprep.subr.bf16.mxu0 %v2938_v37 }
0x11d7   : > { %2200 = vmatpush1.bf16.msra.mxu0 %v2936_v38 }
0x11d8   : > { %2201 = vmatprep.subr.bf16.mxu0 %v2941_v39 }
0x11db   : > { %2202 = vmatpush1.bf16.msra.mxu0 %v2939_v40 }
0x11dc   : > { %2203 = vmatprep.subr.bf16.mxu0 %v2944_v42 }
0x11df   : > { %2204 = vmatpush1.bf16.msra.mxu0 %v2942_v43 }
0x11e0   : > { %2205 = vmatprep.subr.bf16.mxu0 %v2947_v44 }
0x11e3   : > { %2206 = vmatpush1.bf16.msra.mxu0 %v2945_v45 }
0x11e4   : > { %2207 = vmatprep.subr.bf16.mxu0 %v2950_v46 }
0x11e7   : > { %2208 = vmatpush1.bf16.msra.mxu0 %v2948_v14 }
0x11e8   : > { %2209 = vmatprep.subr.bf16.mxu0 %v2953_v47 }
0x11eb   : > { %2210 = vmatpush1.bf16.msra.mxu0 %v2951_v5 }
0x11ec   : > { %2211 = vmatprep.subr.bf16.mxu0 %v2956_v49 }
0x11ef   : > { %2212 = vmatpush1.bf16.msra.mxu0 %v2954_v50 }
0x11f0   : > { %2213 = vmatprep.subr.bf16.mxu0 %v2959_v51 }
0x11f3   : > { %2214 = vmatpush1.bf16.msra.mxu0 %v2957_v52 }
0x11f4   : > { %2215 = vmatprep.subr.bf16.mxu0 %v2962_v55 }
0x11f7   : > { %2216 = vmatpush1.bf16.msra.mxu0 %v2960_v54 }
0x11f8   : > { %2217 = vmatprep.subr.bf16.mxu0 %v2965_v20 }
0x11fb   : > { %2218 = vmatpush1.bf16.msra.mxu0 %v2963_v56 }
0x1235   : > { %v1920_v25 = vpop.xlane.xlu0 %1919 }
0x1236   : > { %2996 = vrcp.f32 %v1920_v25 }
0x1239   : > { %v1742_v19 = vpop.permute.xlu0 %1741 }
0x123a   : > { %1744 = vst.msk [vmem:[#allocation2 + $0x8] sm:$0xff] %vm1280_vm4, %v1742_v19 }
0x123b   : > { %1861 = vst.msk [vmem:[#allocation2 + $0x8] sm:$0xff] %vm1398_vm5, %v1859_v8 }
0x123d   : > { %v1514_v21 = vpop.permute.xlu0 %1513 }
0x123e   : > { %1517 = vst.msk [vmem:[#allocation2] sm:$0xff] %vm1516_vm6, %v1514_v21 }
0x1240   : > { %v2997_v22 = vpop.eup %2996 }
0x1241   : > { %v1922_v23 = vmul.f32 %v2997_v22, %v2995_v15 }
0x1243   : > { %2518 = vst.msk [vmem:[%s3478_s18 + $0x38] sm:$0xff] %vm1099_vm2, %v1922_v23  ;;  %v1925_v24 = vpack.c.bf16 %v1922_v23, %v1922_v23 }
0x1245   : > { %2688 = vmatmul.mubr.msk.bf16.vlgmr.msra.gmra.mrb[64].mxu1 %vm1099_vm2, %v1925_v24  ;;  %v1979_v61 = vld [vmem:[#allocation2] sm:$0xff] }
0x1246   : > { %v1981_v0 = vpack.c.bf16 %v1979_v61, %v1979_v61 }
0x1318   : > { %v1968_v57 = vpop.f32.mrb[64].mxu1 }
0x1319   : > { %1975 = vrot.lane.b32.xlu1 %v1968_v57, %s3197_s16  ;;  %v2689_v58 = vpop.f32.mrb[65].mxu1  ;;  %s3088_s16 = sshll.u32 %s3200_s29, 4  ;;  %s3089_s16 = int_to_ptr.vmem [resolvable:$false] %s3088_s16 }
0x131a   : > { %v1971_v59 = vpop.f32.mrb[66].mxu1  ;;  %s3090_s17 = scalar_lea.vmem %s3089_s16, 2048  ;;  %p3091_p5 = scmp.lt.s32.totalorder %s3661_s15, %s3089_s16 }
0x131b   : > { %v2690_v60 = vpop.f32.mrb[67].mxu1  ;;  %p3092_p9 = scmp.lt.s32.totalorder %s3090_s17, %s3084_s27 }
0x131d   : > { %p3093_p12 = por %p3092_p9, %p3091_p5 }
0x131f   : > { %p3094_p2 = pnand %p3093_p12, %p3087_p3 }
0x138b   : > { %v1976_v41 = vpop.permute.xlu1 %1975 }
0x138c   : > { %1978 = vst.msk [vmem:[#allocation2 + $0x8] sm:$0xff] %vm1516_vm6, %v1976_v41 }
0x1393   : > { %v1980_v62 = vld [vmem:[#allocation2 + $0x8] sm:$0xff] }
0x1394   : > { %v1982_v63 = vpack.c.bf16 %v1980_v62, %v1980_v62 }
0x1396   : > { %2219 = vmatprep.mubr.bf16.mxu0 %v1982_v63 }
0x1397   : > { %2220 = vmatmul.mubr.bf16.vlgmr.msra.gmra.mrb[8].mxu0 %v1981_v0 }
0x1398   : > { %3097 = shalt.err (!%p3094_p2)
}
0x1399   : > { %s3098_s18 = scalar_lea.hbm %s3659_s13, 1024  ;;  %s3102_s8 = scalar_lea.hbm %s3750_s6, 2048 }
0x139a   : > { %p3099_p13 = scmp.ne.s32.totalorder %s3659_s13, %s3098_s18  ;;  %p3103_p4 = scmp.lt.u32.totalorder %s3659_s13, %s3750_s6 }
0x139b   : > { %p3104_p7 = scmp.lt.u32.totalorder %s3102_s8, %s3098_s18  ;;  %p3106_p11 = scmp.lt.u32.totalorder %s3098_s18, %s3659_s13 }
0x139c   : > { %p3100_p6 = pnand %p3099_p13, %p3764_p0 }
0x139d   : > { %p3105_p8 = por %p3104_p7, %p3103_p4 }
0x139e   : > { %p3101_p10 = pneg %p3100_p6 }
0x139f   : > { %p3107_p1 = por %p3106_p11, %p3105_p8 }
0x13a1   : > { %p3108_p3 = pnand %p3107_p1, %p3101_p10 }
0x13a3   : > { %3111 = shalt.err (!%p3108_p3)
}
0x13a4   : > { %s3201_s27 = smov 128   ;;  %s3202_s29 = smov 8   ;;  %v2015_v1 = vld [vmem:[%s3748_s4] sm:$0x3] }
0x13a5   : > { %2702 = dma.vmem_to_hbm [thread:$0]  (%p3764_p0), %s3661_s15, 1024, %s3659_s13, %s2236_s10, %s3201_s27, %s3201_s27, %s3202_s29   ;;  %v2020_v2 = vrot.slane %v2015_v1, %v413_v9  ;;  %v2024_v7 = vrot.slane %v2015_v1, %v417_v36 }
0x13a6   : > { %s2561_s18 = sshll.u32 %s3260_s25, 8  ;;  %s300_s19 = scalar_lea.vmem [#allocation9], %s2396_s9 }
0x13a7   : > { %s2250_s14 = sshll.u32 %s300_s19, 4  ;;  %s3700_s10 = scalar_lea.hbm %s3749_s5, %s2561_s18  ;;  %s3702_s14 = int_to_ptr.vmem [resolvable:$true] %s2250_s14 }
0x13a8   : > { %s2231_s25 = scalar_lea.sflag [#allocation5], %s3408_s20  ;;  %s3112_s9 = scalar_lea.vmem %s3702_s14, 256 }
0x13a9   : > { %p3113_p5 = scmp.ne.s32.totalorder %s3702_s14, %s3112_s9  ;;  %s3203_s8 = smov [#allocation9]  }
0x13aa   : > { %s3116_s7 = sshll.u32 %s3203_s8, 4  ;;  %s3117_s7 = int_to_ptr.vmem [resolvable:$false] %s3116_s7 }
0x13ab   : > { %p3114_p9 = pnand %p3113_p5, %p3764_p0  ;;  %s3118_s30 = scalar_lea.vmem %s3117_s7, 512 }
0x13ac   : > { %p3119_p2 = scmp.lt.s32.totalorder %s3702_s14, %s3117_s7  ;;  %p3120_p13 = scmp.lt.s32.totalorder %s3118_s30, %s3112_s9 }
0x13ad   : > { %p3115_p12 = pneg %p3114_p9 }
0x13ae   : > { %p3121_p6 = por %p3120_p13, %p3119_p2 }
0x13b0   : > { %p3122_p10 = pnand %p3121_p6, %p3115_p12 }
0x146a   : > { %v2221_v10 = vpop.f32.mrb[8].mxu0 }
0x146b   : > { %v2222_v4 = vadd.f32 %v2221_v10, %v2020_v2  ;;  %v2223_v11 = vpop.f32.mrb[9].mxu0 }
0x146c   : > { %v2224_v3 = vadd.f32 %v2223_v11, %v2024_v7  ;;  %v2225_v12 = vpop.f32.mrb[10].mxu0 }
0x146d   : > { %2228 = vst [vmem:[%s300_s19] sm:$0xff] %v2222_v4  ;;  %v2226_v6 = vpop.f32.mrb[11].mxu0 }
0x146e   : > { %2229 = vst [vmem:[%s300_s19 + $0x8] sm:$0xff] %v2224_v3 }
0x146f   : > { %3125 = shalt.err (!%p3122_p10)
}
0x1470   : > { %s3126_s20 = scalar_lea.hbm %s3700_s10, 256  ;;  %s3130_s16 = scalar_lea.hbm %s3749_s5, 512 }
0x1471   : > { %p3127_p4 = scmp.ne.s32.totalorder %s3700_s10, %s3126_s20  ;;  %p3131_p11 = scmp.lt.u32.totalorder %s3700_s10, %s3749_s5 }
0x1472   : > { %p3132_p1 = scmp.lt.u32.totalorder %s3130_s16, %s3126_s20  ;;  %p3134_p5 = scmp.lt.u32.totalorder %s3126_s20, %s3700_s10 }
0x1473   : > { %p3128_p7 = pnand %p3127_p4, %p3764_p0 }
0x1474   : > { %p3133_p3 = por %p3132_p1, %p3131_p11 }
0x1475   : > { %p3129_p8 = pneg %p3128_p7 }
0x1476   : > { %p3135_p9 = por %p3134_p5, %p3133_p3 }
0x1478   : > { %p3136_p12 = pnand %p3135_p9, %p3129_p8 }
0x147a   : > { %3139 = shalt.err (!%p3136_p12)
}
0x147b   : > { %2701 = dma.vmem_to_hbm [thread:$0]  (%p3764_p0), %s3702_s14, 256, %s3700_s10, %s2231_s25  }
0x147c PF: > { %s2278_s19 = sand.u32 1, %s3174_s21   ;;  %p3765_p2 = scmp.ne.s32.totalorder %s3755_s28, 0 }
0x147d   : > { %p3766_p13 = scmp.ge.s32.totalorder %s3186_s24, 2  ;;  %s2279_s15 = scalar_lea.sflag [#allocation5], %s2278_s19 }
0x147f   : > { %p2717_p6 = pnand %p3766_p13, %p3765_p2 }
0x1481   : > { %3165 = dma.done.wait (!%p2717_p6), %s2279_s15, 256  }
0x1482   : > { %3167 = vsyncadd (!%p2717_p6), %s2279_s15, 4294967040  ;;  %s2288_s13 = scalar_lea.sflag [#allocation11], %s2278_s19 }
0x1483   : > { %3169 = dma.done.wait (!%p2717_p6), %s2288_s13, 1024  }
0x1484   : > { %3171 = vsyncadd (!%p2717_p6), %s2288_s13, 4294966272  ;;  %p24_p0 = scmp.ge.s32.totalorder %s3349_s26, 4   ;;  %s3767_s21 = smov %s3178_s22 }
0x1485   : > { %s3768_s22 = smov %s3182_s23  ;;  %s3769_s23 = smov %s3358_s11 }
0x1486   : > { %s3770_s24 = smov %s3349_s26  ;;  %26 = sbr.rel (!%p24_p0) target bundleno = 8 (0x8), region = 117 }
0x148d   :  { %2293 = vsyncpa [#allocation4], 1 }
0x148e   :  { %2295 = vsyncpa [#allocation4 + $0x1], 1 }
0x148f   :  { %2296 = vsyncpa [#allocation7], 1 }
0x1490   :  { %2297 = vsyncpa [#allocation5], 1 }
0x1491   :  { %2299 = vsyncpa [#allocation5 + $0x1], 1 }
0x1492   :  { %2300 = vsyncpa [#allocation11], 1 }
0x1493   :  { %2302 = vsyncpa [#allocation11 + $0x1], 1 }

</bundles_post_ra>
